<compile_context>
chip_gen: v6e
topology: v6e:2x2x1
jax: 0.10.0
libtpu: 0.0.40
codegen_flags: <defaults>
</compile_context>

<pallas_src>
import functools

import jax
import jax.numpy as jnp
from jax import lax
from jax.experimental import pallas as pl
from jax.experimental.pallas import tpu as pltpu

_K = 7
_PAD = (_K - 1) // 2  # 3


def _attention_gate_kernel(x_ref, band_ref, shift_ref, out_ref,
                           flat_ref, zpad_ref, acc_ref, *, H, W):
    # x_ref:     (1, C, H*W)   input dtype, VMEM  (lane-dense: H*W on lanes)
    # band_ref:  (7, 2*(W+6), W) f32, VMEM        (banded conv weights, BN scale folded)
    # shift_ref: (1,) f32, SMEM                   (folded BatchNorm shift)
    # out_ref:   (1, C, H*W)   input dtype, VMEM
    # flat_ref:  (3, H*W) f32 scratch: rows 0/1 = ZPool max/mean, row 2 = gate logits
    # zpad_ref:  (H+6, 2*(W+6)) f32 scratch: the two zero-padded ZPool planes side by side
    # acc_ref:   (H, W) f32 scratch: conv output (pre-sigmoid)
    C = x_ref.shape[1]
    Wp = W + 2 * _PAD

    # ---- ZPool: channel max / mean, f32 accumulation, fully lane-dense --------
    xf = x_ref[0].astype(jnp.float32)                                   # (C, HW)
    flat_ref[0:1, :] = jnp.max(xf, axis=0, keepdims=True)
    flat_ref[1:2, :] = jnp.sum(xf, axis=0, keepdims=True) * jnp.float32(1.0 / C)

    # ---- Stage the padded planes; zero only the 3-wide halo strips ------------
    zpad_ref[0:_PAD, :] = jnp.zeros((_PAD, 2 * Wp), jnp.float32)
    zpad_ref[_PAD + H:_PAD + H + _PAD, :] = jnp.zeros((_PAD, 2 * Wp), jnp.float32)
    zpad_ref[_PAD:_PAD + H, 0:_PAD] = jnp.zeros((H, _PAD), jnp.float32)
    zpad_ref[_PAD:_PAD + H, Wp - _PAD:Wp + _PAD] = jnp.zeros((H, 2 * _PAD), jnp.float32)
    zpad_ref[_PAD:_PAD + H, 2 * Wp - _PAD:2 * Wp] = jnp.zeros((H, _PAD), jnp.float32)
    # Interior: per-row ref->ref copies unflatten (HW,) -> (H, W) through VMEM
    # (avoids unsupported/expensive minor-dim vector reshapes).
    for r in range(H):
        zpad_ref[_PAD + r:_PAD + r + 1, _PAD:_PAD + W] = \
            flat_ref[0:1, r * W:(r + 1) * W]
        zpad_ref[_PAD + r:_PAD + r + 1, Wp + _PAD:Wp + _PAD + W] = \
            flat_ref[1:2, r * W:(r + 1) * W]

    # ---- 7x7 conv (2 -> 1 channel) as 7 banded-Toeplitz matmuls on the MXU ----
    #   y = sum_kh  zpad[kh:kh+H, :] @ band[kh]        (BN scale already folded in)
    acc = jnp.zeros((H, W), jnp.float32)
    for kh in range(_K):
        acc = acc + jnp.dot(zpad_ref[kh:kh + H, :], band_ref[kh],
                            preferred_element_type=jnp.float32)
    acc_ref[...] = acc

    # ---- Flatten the gate logits back to the lane-dense layout ----------------
    for r in range(H):
        flat_ref[2:3, r * W:(r + 1) * W] = acc_ref[r:r + 1, :]

    # ---- folded BatchNorm shift + sigmoid, then rescale x ---------------------
    gate = jax.nn.sigmoid(flat_ref[2:3, :] + shift_ref[0])              # (1, HW) f32
    # Re-read x_ref here (short live range); multiply & store in the input dtype.
    out_ref[0] = x_ref[0] * gate.astype(out_ref.dtype)


def attention_gate(x, conv_w, bn_gamma, bn_beta, bn_mean, bn_var, eps=1e-5):
    """x: (B, C, H, W); conv_w: (1, 2, 7, 7); BN params: shape (1,) each.
    Returns (B, C, H, W) = x * sigmoid(BN(conv7x7(ZPool(x)))), in x.dtype."""
    B, C, H, W = x.shape
    HW = H * W
    Wp = W + 2 * _PAD

    # Fold eval-mode BatchNorm: scale goes into the conv weights, shift stays scalar.
    inv_std = 1.0 / jnp.sqrt(bn_var.astype(jnp.float32) + jnp.float32(eps))
    bn_scale = bn_gamma.astype(jnp.float32) * inv_std                       # (1,)
    bn_shift = bn_beta.astype(jnp.float32) - bn_mean.astype(jnp.float32) * bn_scale

    # Banded-Toeplitz form of the 7x7 conv along W:
    #   band[kh, c*Wp + (j + kw), j] = bn_scale * w[c, kh, kw]
    w = conv_w.astype(jnp.float32)[0]                                       # (2, K, K)
    p = jnp.arange(Wp)[None, :, None]                                       # (1, Wp, 1)
    j = jnp.arange(W)[None, None, :]                                        # (1, 1, W)
    kw = jnp.arange(_K)[:, None, None]                                      # (K, 1, 1)
    ind = (p == j + kw).astype(jnp.float32)                                 # (K, Wp, W)
    band_c = jnp.einsum('cab,bpj->capj', w, ind)                            # (2, K, Wp, W)
    band = jnp.concatenate([band_c[0], band_c[1]], axis=1) * bn_scale[0]    # (K, 2Wp, W)

    # Lane-dense view of the dominant traffic (free, contiguous reshape).
    x_flat = x.reshape(B, C, HW)

    # VMEM budget from the actual block sizes (double-buffered in+out) + margin.
    elt = x.dtype.itemsize
    need = (2 * 2 * C * HW * elt
            + 2 * int(band.size) * 4
            + (3 * HW + (H + 2 * _PAD) * 2 * Wp + H * W) * 4
            + (2 << 20))
    vmem_limit = int(min(max(need, 32 << 20), 128 << 20))

    kernel = functools.partial(_attention_gate_kernel, H=H, W=W)

    out_flat = pl.pallas_call(
        kernel,
        out_shape=jax.ShapeDtypeStruct((B, C, HW), x.dtype),
        grid_spec=pltpu.PrefetchScalarGridSpec(
            num_scalar_prefetch=0,
            grid=(B,),
            in_specs=[
                pl.BlockSpec((1, C, HW), lambda b: (b, 0, 0)),           # x (input dtype)
                pl.BlockSpec((_K, 2 * Wp, W), lambda b: (0, 0, 0)),      # band (constant)
                pl.BlockSpec(memory_space=pltpu.MemorySpace.SMEM),       # bn shift scalar
            ],
            out_specs=pl.BlockSpec((1, C, HW), lambda b: (b, 0, 0)),
            scratch_shapes=[
                pltpu.VMEM((3, HW), jnp.float32),                        # flat planes/gate
                pltpu.VMEM((H + 2 * _PAD, 2 * Wp), jnp.float32),         # padded planes
                pltpu.VMEM((H, W), jnp.float32),                         # conv output
            ],
        ),
        compiler_params=pltpu.CompilerParams(
            dimension_semantics=("parallel",),
            vmem_limit_bytes=vmem_limit,
        ),
    )(x_flat, band, bn_shift)

    return out_flat.reshape(B, C, H, W)


if __name__ == "__main__":
    key = jax.random.PRNGKey(0)
    kx, kw_, kg, kb, km, kv = jax.random.split(key, 6)

    B, C, H, W = 2, 4, 16, 16
    x = jax.random.normal(kx, (B, C, H, W), dtype=jnp.float32)
    # Conv2d(2, 1, 7, padding=3, bias=False).weight -> (1, 2, 7, 7)
    conv_w = jax.random.normal(kw_, (1, 2, _K, _K), dtype=jnp.float32) * 0.1
    # BatchNorm2d(1) parameters / running stats (non-trivial to exercise folding).
    bn_gamma = 1.0 + 0.1 * jax.random.normal(kg, (1,), dtype=jnp.float32)
    bn_beta = 0.1 * jax.random.normal(kb, (1,), dtype=jnp.float32)
    bn_mean = 0.1 * jax.random.normal(km, (1,), dtype=jnp.float32)
    bn_var = jax.random.uniform(kv, (1,), dtype=jnp.float32, minval=0.5, maxval=1.5)

    out = attention_gate(x, conv_w, bn_gamma, bn_beta, bn_mean, bn_var)
    jax.block_until_ready(out)

    # Pure-JAX reference of the same forward pass (eval-mode BatchNorm).
    z = jnp.stack([jnp.max(x, axis=1), jnp.mean(x, axis=1)], axis=1)       # (B, 2, H, W)
    y = lax.conv_general_dilated(
        z, conv_w, window_strides=(1, 1), padding=((_PAD, _PAD), (_PAD, _PAD)),
        dimension_numbers=("NCHW", "OIHW", "NCHW"),
        precision=lax.Precision.HIGHEST)                                    # (B, 1, H, W)
    y = (y - bn_mean[0]) * (bn_gamma[0] / jnp.sqrt(bn_var[0] + 1e-5)) + bn_beta[0]
    ref = x * jax.nn.sigmoid(y)

    assert out.shape == (B, C, H, W) and out.dtype == x.dtype
    assert jnp.allclose(out, ref, atol=1e-4, rtol=1e-4)

    # bf16 path: input dtype is preserved end-to-end (no wrapper upcast).
    x_bf = x.astype(jnp.bfloat16)
    out_bf = attention_gate(x_bf, conv_w, bn_gamma, bn_beta, bn_mean, bn_var)
    jax.block_until_ready(out_bf)
    assert out_bf.dtype == jnp.bfloat16 and out_bf.shape == (B, C, H, W)
    assert float(jnp.max(jnp.abs(out_bf.astype(jnp.float32) - ref))) < 0.1

    print("KERNEL_OK")
</pallas_src>

<mosaic_0001>
module attributes {stable_mosaic.version = 11 : i64} {
  func.func @_attention_gate_kernel(%arg0: i32, %arg1: memref<1x4x256xf32, #tpu.memory_space<vmem>>, %arg2: memref<7x44x16xf32, #tpu.memory_space<vmem>>, %arg3: memref<1xf32, #tpu.memory_space<smem>>, %arg4: memref<1x4x256xf32, #tpu.memory_space<vmem>>, %arg5: memref<3x256xf32, #tpu.memory_space<vmem>>, %arg6: memref<22x44xf32, #tpu.memory_space<vmem>>, %arg7: memref<16x16xf32, #tpu.memory_space<vmem>>) attributes {dimension_semantics = [#tpu.dimension_semantics<parallel>], iteration_bounds = array<i64: 2>, scalar_prefetch = 0 : i64, scratch_operands = 3 : i64, tpu.core_type = #tpu.core_type<tc>, window_params = [{transform_indices = @transform_0, window_bounds = array<i64: 1, 4, 256>}, {pipeline_mode = #tpu.pipeline_mode<synchronous>, transform_indices = @transform_1, window_bounds = array<i64: 7, 44, 16>}, {transform_indices = @transform_2, window_bounds = array<i64: 1>}, {transform_indices = @transform_3, window_bounds = array<i64: 1, 4, 256>}]} {
    %c0 = arith.constant 0 : index
    %c0_0 = arith.constant 0 : index
    %c0_1 = arith.constant 0 : index
    %0 = vector.load %arg1[%c0, %c0_0, %c0_1] : memref<1x4x256xf32, #tpu.memory_space<vmem>>, vector<1x4x256xf32>
    %1 = vector.shape_cast %0 : vector<1x4x256xf32> to vector<4x256xf32>
    %cst = arith.constant dense<0xFF800000> : vector<256xf32>
    %2 = vector.multi_reduction <maximumf>, %1, %cst [0] : vector<4x256xf32> to vector<256xf32>
    %3 = vector.shape_cast %2 : vector<256xf32> to vector<1x256xf32>
    %c0_2 = arith.constant 0 : index
    %c0_3 = arith.constant 0 : index
    %4 = vector.load %arg5[%c0_2, %c0_3] : memref<3x256xf32, #tpu.memory_space<vmem>>, vector<1x256xf32>
    tpu.vector_store %arg5[%c0_2, %c0_3], %3 {strides = array<i32>} : memref<3x256xf32, #tpu.memory_space<vmem>>, vector<1x256xf32>,
    %cst_4 = arith.constant dense<0.000000e+00> : vector<256xf32>
    %5 = vector.multi_reduction <add>, %1, %cst_4 [0] : vector<4x256xf32> to vector<256xf32>
    %6 = vector.shape_cast %5 : vector<256xf32> to vector<1x256xf32>
    %cst_5 = arith.constant 2.500000e-01 : f32
    %7 = vector.broadcast %cst_5 : f32 to vector<1x256xf32>
    %8 = arith.mulf %6, %7 : vector<1x256xf32>
    %c1 = arith.constant 1 : index
    %c0_6 = arith.constant 0 : index
    %9 = vector.load %arg5[%c1, %c0_6] : memref<3x256xf32, #tpu.memory_space<vmem>>, vector<1x256xf32>
    tpu.vector_store %arg5[%c1, %c0_6], %8 {strides = array<i32>} : memref<3x256xf32, #tpu.memory_space<vmem>>, vector<1x256xf32>,
    %cst_7 = arith.constant 0.000000e+00 : f32
    %10 = vector.broadcast %cst_7 : f32 to vector<3x44xf32>
    %c0_8 = arith.constant 0 : index
    %c0_9 = arith.constant 0 : index
    %11 = vector.load %arg6[%c0_8, %c0_9] : memref<22x44xf32, #tpu.memory_space<vmem>>, vector<3x44xf32>
    tpu.vector_store %arg6[%c0_8, %c0_9], %10 {strides = array<i32>} : memref<22x44xf32, #tpu.memory_space<vmem>>, vector<3x44xf32>,
    %cst_10 = arith.constant 0.000000e+00 : f32
    %12 = vector.broadcast %cst_10 : f32 to vector<3x44xf32>
    %c19 = arith.constant 19 : index
    %c0_11 = arith.constant 0 : index
    %13 = vector.load %arg6[%c19, %c0_11] : memref<22x44xf32, #tpu.memory_space<vmem>>, vector<3x44xf32>
    tpu.vector_store %arg6[%c19, %c0_11], %12 {strides = array<i32>} : memref<22x44xf32, #tpu.memory_space<vmem>>, vector<3x44xf32>,
    %cst_12 = arith.constant 0.000000e+00 : f32
    %14 = vector.broadcast %cst_12 : f32 to vector<16x3xf32>
    %c3 = arith.constant 3 : index
    %c0_13 = arith.constant 0 : index
    %15 = vector.load %arg6[%c3, %c0_13] : memref<22x44xf32, #tpu.memory_space<vmem>>, vector<16x3xf32>
    tpu.vector_store %arg6[%c3, %c0_13], %14 {strides = array<i32>} : memref<22x44xf32, #tpu.memory_space<vmem>>, vector<16x3xf32>,
    %cst_14 = arith.constant 0.000000e+00 : f32
    %16 = vector.broadcast %cst_14 : f32 to vector<16x6xf32>
    %c3_15 = arith.constant 3 : index
    %c19_16 = arith.constant 19 : index
    %17 = vector.load %arg6[%c3_15, %c19_16] : memref<22x44xf32, #tpu.memory_space<vmem>>, vector<16x6xf32>
    tpu.vector_store %arg6[%c3_15, %c19_16], %16 {strides = array<i32>} : memref<22x44xf32, #tpu.memory_space<vmem>>, vector<16x6xf32>,
    %cst_17 = arith.constant 0.000000e+00 : f32
    %18 = vector.broadcast %cst_17 : f32 to vector<16x3xf32>
    %c3_18 = arith.constant 3 : index
    %c41 = arith.constant 41 : index
    %19 = vector.load %arg6[%c3_18, %c41] : memref<22x44xf32, #tpu.memory_space<vmem>>, vector<16x3xf32>
    tpu.vector_store %arg6[%c3_18, %c41], %18 {strides = array<i32>} : memref<22x44xf32, #tpu.memory_space<vmem>>, vector<16x3xf32>,
    %c0_19 = arith.constant 0 : index
    %c0_20 = arith.constant 0 : index
    %20 = vector.load %arg5[%c0_19, %c0_20] : memref<3x256xf32, #tpu.memory_space<vmem>>, vector<1x16xf32>
    %c3_21 = arith.constant 3 : index
    %c3_22 = arith.constant 3 : index
    %21 = vector.load %arg6[%c3_21, %c3_22] : memref<22x44xf32, #tpu.memory_space<vmem>>, vector<1x16xf32>
    tpu.vector_store %arg6[%c3_21, %c3_22], %20 {strides = array<i32>} : memref<22x44xf32, #tpu.memory_space<vmem>>, vector<1x16xf32>,
    %c1_23 = arith.constant 1 : index
    %c0_24 = arith.constant 0 : index
    %22 = vector.load %arg5[%c1_23, %c0_24] : memref<3x256xf32, #tpu.memory_space<vmem>>, vector<1x16xf32>
    %c3_25 = arith.constant 3 : index
    %c25 = arith.constant 25 : index
    %23 = vector.load %arg6[%c3_25, %c25] : memref<22x44xf32, #tpu.memory_space<vmem>>, vector<1x16xf32>
    tpu.vector_store %arg6[%c3_25, %c25], %22 {strides = array<i32>} : memref<22x44xf32, #tpu.memory_space<vmem>>, vector<1x16xf32>,
    %c0_26 = arith.constant 0 : index
    %c16 = arith.constant 16 : index
    %24 = vector.load %arg5[%c0_26, %c16] : memref<3x256xf32, #tpu.memory_space<vmem>>, vector<1x16xf32>
    %c4 = arith.constant 4 : index
    %c3_27 = arith.constant 3 : index
    %25 = vector.load %arg6[%c4, %c3_27] : memref<22x44xf32, #tpu.memory_space<vmem>>, vector<1x16xf32>
    tpu.vector_store %arg6[%c4, %c3_27], %24 {strides = array<i32>} : memref<22x44xf32, #tpu.memory_space<vmem>>, vector<1x16xf32>,
    %c1_28 = arith.constant 1 : index
    %c16_29 = arith.constant 16 : index
    %26 = vector.load %arg5[%c1_28, %c16_29] : memref<3x256xf32, #tpu.memory_space<vmem>>, vector<1x16xf32>
    %c4_30 = arith.constant 4 : index
    %c25_31 = arith.constant 25 : index
    %27 = vector.load %arg6[%c4_30, %c25_31] : memref<22x44xf32, #tpu.memory_space<vmem>>, vector<1x16xf32>
    tpu.vector_store %arg6[%c4_30, %c25_31], %26 {strides = array<i32>} : memref<22x44xf32, #tpu.memory_space<vmem>>, vector<1x16xf32>,
    %c0_32 = arith.constant 0 : index
    %c32 = arith.constant 32 : index
    %28 = vector.load %arg5[%c0_32, %c32] : memref<3x256xf32, #tpu.memory_space<vmem>>, vector<1x16xf32>
    %c5 = arith.constant 5 : index
    %c3_33 = arith.constant 3 : index
    %29 = vector.load %arg6[%c5, %c3_33] : memref<22x44xf32, #tpu.memory_space<vmem>>, vector<1x16xf32>
    tpu.vector_store %arg6[%c5, %c3_33], %28 {strides = array<i32>} : memref<22x44xf32, #tpu.memory_space<vmem>>, vector<1x16xf32>,
    %c1_34 = arith.constant 1 : index
    %c32_35 = arith.constant 32 : index
    %30 = vector.load %arg5[%c1_34, %c32_35] : memref<3x256xf32, #tpu.memory_space<vmem>>, vector<1x16xf32>
    %c5_36 = arith.constant 5 : index
    %c25_37 = arith.constant 25 : index
    %31 = vector.load %arg6[%c5_36, %c25_37] : memref<22x44xf32, #tpu.memory_space<vmem>>, vector<1x16xf32>
    tpu.vector_store %arg6[%c5_36, %c25_37], %30 {strides = array<i32>} : memref<22x44xf32, #tpu.memory_space<vmem>>, vector<1x16xf32>,
    %c0_38 = arith.constant 0 : index
    %c48 = arith.constant 48 : index
    %32 = vector.load %arg5[%c0_38, %c48] : memref<3x256xf32, #tpu.memory_space<vmem>>, vector<1x16xf32>
    %c6 = arith.constant 6 : index
    %c3_39 = arith.constant 3 : index
    %33 = vector.load %arg6[%c6, %c3_39] : memref<22x44xf32, #tpu.memory_space<vmem>>, vector<1x16xf32>
    tpu.vector_store %arg6[%c6, %c3_39], %32 {strides = array<i32>} : memref<22x44xf32, #tpu.memory_space<vmem>>, vector<1x16xf32>,
    %c1_40 = arith.constant 1 : index
    %c48_41 = arith.constant 48 : index
    %34 = vector.load %arg5[%c1_40, %c48_41] : memref<3x256xf32, #tpu.memory_space<vmem>>, vector<1x16xf32>
    %c6_42 = arith.constant 6 : index
    %c25_43 = arith.constant 25 : index
    %35 = vector.load %arg6[%c6_42, %c25_43] : memref<22x44xf32, #tpu.memory_space<vmem>>, vector<1x16xf32>
    tpu.vector_store %arg6[%c6_42, %c25_43], %34 {strides = array<i32>} : memref<22x44xf32, #tpu.memory_space<vmem>>, vector<1x16xf32>,
    %c0_44 = arith.constant 0 : index
    %c64 = arith.constant 64 : index
    %36 = vector.load %arg5[%c0_44, %c64] : memref<3x256xf32, #tpu.memory_space<vmem>>, vector<1x16xf32>
    %c7 = arith.constant 7 : index
    %c3_45 = arith.constant 3 : index
    %37 = vector.load %arg6[%c7, %c3_45] : memref<22x44xf32, #tpu.memory_space<vmem>>, vector<1x16xf32>
    tpu.vector_store %arg6[%c7, %c3_45], %36 {strides = array<i32>} : memref<22x44xf32, #tpu.memory_space<vmem>>, vector<1x16xf32>,
    %c1_46 = arith.constant 1 : index
    %c64_47 = arith.constant 64 : index
    %38 = vector.load %arg5[%c1_46, %c64_47] : memref<3x256xf32, #tpu.memory_space<vmem>>, vector<1x16xf32>
    %c7_48 = arith.constant 7 : index
    %c25_49 = arith.constant 25 : index
    %39 = vector.load %arg6[%c7_48, %c25_49] : memref<22x44xf32, #tpu.memory_space<vmem>>, vector<1x16xf32>
    tpu.vector_store %arg6[%c7_48, %c25_49], %38 {strides = array<i32>} : memref<22x44xf32, #tpu.memory_space<vmem>>, vector<1x16xf32>,
    %c0_50 = arith.constant 0 : index
    %c80 = arith.constant 80 : index
    %40 = vector.load %arg5[%c0_50, %c80] : memref<3x256xf32, #tpu.memory_space<vmem>>, vector<1x16xf32>
    %c8 = arith.constant 8 : index
    %c3_51 = arith.constant 3 : index
    %41 = vector.load %arg6[%c8, %c3_51] : memref<22x44xf32, #tpu.memory_space<vmem>>, vector<1x16xf32>
    tpu.vector_store %arg6[%c8, %c3_51], %40 {strides = array<i32>} : memref<22x44xf32, #tpu.memory_space<vmem>>, vector<1x16xf32>,
    %c1_52 = arith.constant 1 : index
    %c80_53 = arith.constant 80 : index
    %42 = vector.load %arg5[%c1_52, %c80_53] : memref<3x256xf32, #tpu.memory_space<vmem>>, vector<1x16xf32>
    %c8_54 = arith.constant 8 : index
    %c25_55 = arith.constant 25 : index
    %43 = vector.load %arg6[%c8_54, %c25_55] : memref<22x44xf32, #tpu.memory_space<vmem>>, vector<1x16xf32>
    tpu.vector_store %arg6[%c8_54, %c25_55], %42 {strides = array<i32>} : memref<22x44xf32, #tpu.memory_space<vmem>>, vector<1x16xf32>,
    %c0_56 = arith.constant 0 : index
    %c96 = arith.constant 96 : index
    %44 = vector.load %arg5[%c0_56, %c96] : memref<3x256xf32, #tpu.memory_space<vmem>>, vector<1x16xf32>
    %c9 = arith.constant 9 : index
    %c3_57 = arith.constant 3 : index
    %45 = vector.load %arg6[%c9, %c3_57] : memref<22x44xf32, #tpu.memory_space<vmem>>, vector<1x16xf32>
    tpu.vector_store %arg6[%c9, %c3_57], %44 {strides = array<i32>} : memref<22x44xf32, #tpu.memory_space<vmem>>, vector<1x16xf32>,
    %c1_58 = arith.constant 1 : index
    %c96_59 = arith.constant 96 : index
    %46 = vector.load %arg5[%c1_58, %c96_59] : memref<3x256xf32, #tpu.memory_space<vmem>>, vector<1x16xf32>
    %c9_60 = arith.constant 9 : index
    %c25_61 = arith.constant 25 : index
    %47 = vector.load %arg6[%c9_60, %c25_61] : memref<22x44xf32, #tpu.memory_space<vmem>>, vector<1x16xf32>
    tpu.vector_store %arg6[%c9_60, %c25_61], %46 {strides = array<i32>} : memref<22x44xf32, #tpu.memory_space<vmem>>, vector<1x16xf32>,
    %c0_62 = arith.constant 0 : index
    %c112 = arith.constant 112 : index
    %48 = vector.load %arg5[%c0_62, %c112] : memref<3x256xf32, #tpu.memory_space<vmem>>, vector<1x16xf32>
    %c10 = arith.constant 10 : index
    %c3_63 = arith.constant 3 : index
    %49 = vector.load %arg6[%c10, %c3_63] : memref<22x44xf32, #tpu.memory_space<vmem>>, vector<1x16xf32>
    tpu.vector_store %arg6[%c10, %c3_63], %48 {strides = array<i32>} : memref<22x44xf32, #tpu.memory_space<vmem>>, vector<1x16xf32>,
    %c1_64 = arith.constant 1 : index
    %c112_65 = arith.constant 112 : index
    %50 = vector.load %arg5[%c1_64, %c112_65] : memref<3x256xf32, #tpu.memory_space<vmem>>, vector<1x16xf32>
    %c10_66 = arith.constant 10 : index
    %c25_67 = arith.constant 25 : index
    %51 = vector.load %arg6[%c10_66, %c25_67] : memref<22x44xf32, #tpu.memory_space<vmem>>, vector<1x16xf32>
    tpu.vector_store %arg6[%c10_66, %c25_67], %50 {strides = array<i32>} : memref<22x44xf32, #tpu.memory_space<vmem>>, vector<1x16xf32>,
    %c0_68 = arith.constant 0 : index
    %c128 = arith.constant 128 : index
    %52 = vector.load %arg5[%c0_68, %c128] : memref<3x256xf32, #tpu.memory_space<vmem>>, vector<1x16xf32>
    %c11 = arith.constant 11 : index
    %c3_69 = arith.constant 3 : index
    %53 = vector.load %arg6[%c11, %c3_69] : memref<22x44xf32, #tpu.memory_space<vmem>>, vector<1x16xf32>
    tpu.vector_store %arg6[%c11, %c3_69], %52 {strides = array<i32>} : memref<22x44xf32, #tpu.memory_space<vmem>>, vector<1x16xf32>,
    %c1_70 = arith.constant 1 : index
    %c128_71 = arith.constant 128 : index
    %54 = vector.load %arg5[%c1_70, %c128_71] : memref<3x256xf32, #tpu.memory_space<vmem>>, vector<1x16xf32>
    %c11_72 = arith.constant 11 : index
    %c25_73 = arith.constant 25 : index
    %55 = vector.load %arg6[%c11_72, %c25_73] : memref<22x44xf32, #tpu.memory_space<vmem>>, vector<1x16xf32>
    tpu.vector_store %arg6[%c11_72, %c25_73], %54 {strides = array<i32>} : memref<22x44xf32, #tpu.memory_space<vmem>>, vector<1x16xf32>,
    %c0_74 = arith.constant 0 : index
    %c144 = arith.constant 144 : index
    %56 = vector.load %arg5[%c0_74, %c144] : memref<3x256xf32, #tpu.memory_space<vmem>>, vector<1x16xf32>
    %c12 = arith.constant 12 : index
    %c3_75 = arith.constant 3 : index
    %57 = vector.load %arg6[%c12, %c3_75] : memref<22x44xf32, #tpu.memory_space<vmem>>, vector<1x16xf32>
    tpu.vector_store %arg6[%c12, %c3_75], %56 {strides = array<i32>} : memref<22x44xf32, #tpu.memory_space<vmem>>, vector<1x16xf32>,
    %c1_76 = arith.constant 1 : index
    %c144_77 = arith.constant 144 : index
    %58 = vector.load %arg5[%c1_76, %c144_77] : memref<3x256xf32, #tpu.memory_space<vmem>>, vector<1x16xf32>
    %c12_78 = arith.constant 12 : index
    %c25_79 = arith.constant 25 : index
    %59 = vector.load %arg6[%c12_78, %c25_79] : memref<22x44xf32, #tpu.memory_space<vmem>>, vector<1x16xf32>
    tpu.vector_store %arg6[%c12_78, %c25_79], %58 {strides = array<i32>} : memref<22x44xf32, #tpu.memory_space<vmem>>, vector<1x16xf32>,
    %c0_80 = arith.constant 0 : index
    %c160 = arith.constant 160 : index
    %60 = vector.load %arg5[%c0_80, %c160] : memref<3x256xf32, #tpu.memory_space<vmem>>, vector<1x16xf32>
    %c13 = arith.constant 13 : index
    %c3_81 = arith.constant 3 : index
    %61 = vector.load %arg6[%c13, %c3_81] : memref<22x44xf32, #tpu.memory_space<vmem>>, vector<1x16xf32>
    tpu.vector_store %arg6[%c13, %c3_81], %60 {strides = array<i32>} : memref<22x44xf32, #tpu.memory_space<vmem>>, vector<1x16xf32>,
    %c1_82 = arith.constant 1 : index
    %c160_83 = arith.constant 160 : index
    %62 = vector.load %arg5[%c1_82, %c160_83] : memref<3x256xf32, #tpu.memory_space<vmem>>, vector<1x16xf32>
    %c13_84 = arith.constant 13 : index
    %c25_85 = arith.constant 25 : index
    %63 = vector.load %arg6[%c13_84, %c25_85] : memref<22x44xf32, #tpu.memory_space<vmem>>, vector<1x16xf32>
    tpu.vector_store %arg6[%c13_84, %c25_85], %62 {strides = array<i32>} : memref<22x44xf32, #tpu.memory_space<vmem>>, vector<1x16xf32>,
    %c0_86 = arith.constant 0 : index
    %c176 = arith.constant 176 : index
    %64 = vector.load %arg5[%c0_86, %c176] : memref<3x256xf32, #tpu.memory_space<vmem>>, vector<1x16xf32>
    %c14 = arith.constant 14 : index
    %c3_87 = arith.constant 3 : index
    %65 = vector.load %arg6[%c14, %c3_87] : memref<22x44xf32, #tpu.memory_space<vmem>>, vector<1x16xf32>
    tpu.vector_store %arg6[%c14, %c3_87], %64 {strides = array<i32>} : memref<22x44xf32, #tpu.memory_space<vmem>>, vector<1x16xf32>,
    %c1_88 = arith.constant 1 : index
    %c176_89 = arith.constant 176 : index
    %66 = vector.load %arg5[%c1_88, %c176_89] : memref<3x256xf32, #tpu.memory_space<vmem>>, vector<1x16xf32>
    %c14_90 = arith.constant 14 : index
    %c25_91 = arith.constant 25 : index
    %67 = vector.load %arg6[%c14_90, %c25_91] : memref<22x44xf32, #tpu.memory_space<vmem>>, vector<1x16xf32>
    tpu.vector_store %arg6[%c14_90, %c25_91], %66 {strides = array<i32>} : memref<22x44xf32, #tpu.memory_space<vmem>>, vector<1x16xf32>,
    %c0_92 = arith.constant 0 : index
    %c192 = arith.constant 192 : index
    %68 = vector.load %arg5[%c0_92, %c192] : memref<3x256xf32, #tpu.memory_space<vmem>>, vector<1x16xf32>
    %c15 = arith.constant 15 : index
    %c3_93 = arith.constant 3 : index
    %69 = vector.load %arg6[%c15, %c3_93] : memref<22x44xf32, #tpu.memory_space<vmem>>, vector<1x16xf32>
    tpu.vector_store %arg6[%c15, %c3_93], %68 {strides = array<i32>} : memref<22x44xf32, #tpu.memory_space<vmem>>, vector<1x16xf32>,
    %c1_94 = arith.constant 1 : index
    %c192_95 = arith.constant 192 : index
    %70 = vector.load %arg5[%c1_94, %c192_95] : memref<3x256xf32, #tpu.memory_space<vmem>>, vector<1x16xf32>
    %c15_96 = arith.constant 15 : index
    %c25_97 = arith.constant 25 : index
    %71 = vector.load %arg6[%c15_96, %c25_97] : memref<22x44xf32, #tpu.memory_space<vmem>>, vector<1x16xf32>
    tpu.vector_store %arg6[%c15_96, %c25_97], %70 {strides = array<i32>} : memref<22x44xf32, #tpu.memory_space<vmem>>, vector<1x16xf32>,
    %c0_98 = arith.constant 0 : index
    %c208 = arith.constant 208 : index
    %72 = vector.load %arg5[%c0_98, %c208] : memref<3x256xf32, #tpu.memory_space<vmem>>, vector<1x16xf32>
    %c16_99 = arith.constant 16 : index
    %c3_100 = arith.constant 3 : index
    %73 = vector.load %arg6[%c16_99, %c3_100] : memref<22x44xf32, #tpu.memory_space<vmem>>, vector<1x16xf32>
    tpu.vector_store %arg6[%c16_99, %c3_100], %72 {strides = array<i32>} : memref<22x44xf32, #tpu.memory_space<vmem>>, vector<1x16xf32>,
    %c1_101 = arith.constant 1 : index
    %c208_102 = arith.constant 208 : index
    %74 = vector.load %arg5[%c1_101, %c208_102] : memref<3x256xf32, #tpu.memory_space<vmem>>, vector<1x16xf32>
    %c16_103 = arith.constant 16 : index
    %c25_104 = arith.constant 25 : index
    %75 = vector.load %arg6[%c16_103, %c25_104] : memref<22x44xf32, #tpu.memory_space<vmem>>, vector<1x16xf32>
    tpu.vector_store %arg6[%c16_103, %c25_104], %74 {strides = array<i32>} : memref<22x44xf32, #tpu.memory_space<vmem>>, vector<1x16xf32>,
    %c0_105 = arith.constant 0 : index
    %c224 = arith.constant 224 : index
    %76 = vector.load %arg5[%c0_105, %c224] : memref<3x256xf32, #tpu.memory_space<vmem>>, vector<1x16xf32>
    %c17 = arith.constant 17 : index
    %c3_106 = arith.constant 3 : index
    %77 = vector.load %arg6[%c17, %c3_106] : memref<22x44xf32, #tpu.memory_space<vmem>>, vector<1x16xf32>
    tpu.vector_store %arg6[%c17, %c3_106], %76 {strides = array<i32>} : memref<22x44xf32, #tpu.memory_space<vmem>>, vector<1x16xf32>,
    %c1_107 = arith.constant 1 : index
    %c224_108 = arith.constant 224 : index
    %78 = vector.load %arg5[%c1_107, %c224_108] : memref<3x256xf32, #tpu.memory_space<vmem>>, vector<1x16xf32>
    %c17_109 = arith.constant 17 : index
    %c25_110 = arith.constant 25 : index
    %79 = vector.load %arg6[%c17_109, %c25_110] : memref<22x44xf32, #tpu.memory_space<vmem>>, vector<1x16xf32>
    tpu.vector_store %arg6[%c17_109, %c25_110], %78 {strides = array<i32>} : memref<22x44xf32, #tpu.memory_space<vmem>>, vector<1x16xf32>,
    %c0_111 = arith.constant 0 : index
    %c240 = arith.constant 240 : index
    %80 = vector.load %arg5[%c0_111, %c240] : memref<3x256xf32, #tpu.memory_space<vmem>>, vector<1x16xf32>
    %c18 = arith.constant 18 : index
    %c3_112 = arith.constant 3 : index
    %81 = vector.load %arg6[%c18, %c3_112] : memref<22x44xf32, #tpu.memory_space<vmem>>, vector<1x16xf32>
    tpu.vector_store %arg6[%c18, %c3_112], %80 {strides = array<i32>} : memref<22x44xf32, #tpu.memory_space<vmem>>, vector<1x16xf32>,
    %c1_113 = arith.constant 1 : index
    %c240_114 = arith.constant 240 : index
    %82 = vector.load %arg5[%c1_113, %c240_114] : memref<3x256xf32, #tpu.memory_space<vmem>>, vector<1x16xf32>
    %c18_115 = arith.constant 18 : index
    %c25_116 = arith.constant 25 : index
    %83 = vector.load %arg6[%c18_115, %c25_116] : memref<22x44xf32, #tpu.memory_space<vmem>>, vector<1x16xf32>
    tpu.vector_store %arg6[%c18_115, %c25_116], %82 {strides = array<i32>} : memref<22x44xf32, #tpu.memory_space<vmem>>, vector<1x16xf32>,
    %cst_117 = arith.constant 0.000000e+00 : f32
    %84 = vector.broadcast %cst_117 : f32 to vector<16x16xf32>
    %c0_118 = arith.constant 0 : index
    %c0_119 = arith.constant 0 : index
    %85 = vector.load %arg6[%c0_118, %c0_119] : memref<22x44xf32, #tpu.memory_space<vmem>>, vector<16x44xf32>
    %c0_120 = arith.constant 0 : index
    %c0_121 = arith.constant 0 : index
    %c0_122 = arith.constant 0 : index
    %86 = vector.load %arg2[%c0_120, %c0_121, %c0_122] : memref<7x44x16xf32, #tpu.memory_space<vmem>>, vector<1x44x16xf32>
    %87 = vector.shape_cast %86 : vector<1x44x16xf32> to vector<44x16xf32>
    %cst_123 = arith.constant dense<0.000000e+00> : vector<16x16xf32>
    %88 = tpu.matmul %85, %87, %cst_123 {dimension_numbers = #tpu.dot_dimension_numbers<[1], [0], [0], [1], [0, 0, 1, 1], [], []>} : vector<16x44xf32>, vector<44x16xf32>, vector<16x16xf32> -> vector<16x16xf32>
    %89 = arith.addf %84, %88 : vector<16x16xf32>
    %c1_124 = arith.constant 1 : index
    %c0_125 = arith.constant 0 : index
    %90 = vector.load %arg6[%c1_124, %c0_125] : memref<22x44xf32, #tpu.memory_space<vmem>>, vector<16x44xf32>
    %c1_126 = arith.constant 1 : index
    %c0_127 = arith.constant 0 : index
    %c0_128 = arith.constant 0 : index
    %91 = vector.load %arg2[%c1_126, %c0_127, %c0_128] : memref<7x44x16xf32, #tpu.memory_space<vmem>>, vector<1x44x16xf32>
    %92 = vector.shape_cast %91 : vector<1x44x16xf32> to vector<44x16xf32>
    %cst_129 = arith.constant dense<0.000000e+00> : vector<16x16xf32>
    %93 = tpu.matmul %90, %92, %cst_129 {dimension_numbers = #tpu.dot_dimension_numbers<[1], [0], [0], [1], [0, 0, 1, 1], [], []>} : vector<16x44xf32>, vector<44x16xf32>, vector<16x16xf32> -> vector<16x16xf32>
    %94 = arith.addf %89, %93 : vector<16x16xf32>
    %c2 = arith.constant 2 : index
    %c0_130 = arith.constant 0 : index
    %95 = vector.load %arg6[%c2, %c0_130] : memref<22x44xf32, #tpu.memory_space<vmem>>, vector<16x44xf32>
    %c2_131 = arith.constant 2 : index
    %c0_132 = arith.constant 0 : index
    %c0_133 = arith.constant 0 : index
    %96 = vector.load %arg2[%c2_131, %c0_132, %c0_133] : memref<7x44x16xf32, #tpu.memory_space<vmem>>, vector<1x44x16xf32>
    %97 = vector.shape_cast %96 : vector<1x44x16xf32> to vector<44x16xf32>
    %cst_134 = arith.constant dense<0.000000e+00> : vector<16x16xf32>
    %98 = tpu.matmul %95, %97, %cst_134 {dimension_numbers = #tpu.dot_dimension_numbers<[1], [0], [0], [1], [0, 0, 1, 1], [], []>} : vector<16x44xf32>, vector<44x16xf32>, vector<16x16xf32> -> vector<16x16xf32>
    %99 = arith.addf %94, %98 : vector<16x16xf32>
    %c3_135 = arith.constant 3 : index
    %c0_136 = arith.constant 0 : index
    %100 = vector.load %arg6[%c3_135, %c0_136] : memref<22x44xf32, #tpu.memory_space<vmem>>, vector<16x44xf32>
    %c3_137 = arith.constant 3 : index
    %c0_138 = arith.constant 0 : index
    %c0_139 = arith.constant 0 : index
    %101 = vector.load %arg2[%c3_137, %c0_138, %c0_139] : memref<7x44x16xf32, #tpu.memory_space<vmem>>, vector<1x44x16xf32>
    %102 = vector.shape_cast %101 : vector<1x44x16xf32> to vector<44x16xf32>
    %cst_140 = arith.constant dense<0.000000e+00> : vector<16x16xf32>
    %103 = tpu.matmul %100, %102, %cst_140 {dimension_numbers = #tpu.dot_dimension_numbers<[1], [0], [0], [1], [0, 0, 1, 1], [], []>} : vector<16x44xf32>, vector<44x16xf32>, vector<16x16xf32> -> vector<16x16xf32>
    %104 = arith.addf %99, %103 : vector<16x16xf32>
    %c4_141 = arith.constant 4 : index
    %c0_142 = arith.constant 0 : index
    %105 = vector.load %arg6[%c4_141, %c0_142] : memref<22x44xf32, #tpu.memory_space<vmem>>, vector<16x44xf32>
    %c4_143 = arith.constant 4 : index
    %c0_144 = arith.constant 0 : index
    %c0_145 = arith.constant 0 : index
    %106 = vector.load %arg2[%c4_143, %c0_144, %c0_145] : memref<7x44x16xf32, #tpu.memory_space<vmem>>, vector<1x44x16xf32>
    %107 = vector.shape_cast %106 : vector<1x44x16xf32> to vector<44x16xf32>
    %cst_146 = arith.constant dense<0.000000e+00> : vector<16x16xf32>
    %108 = tpu.matmul %105, %107, %cst_146 {dimension_numbers = #tpu.dot_dimension_numbers<[1], [0], [0], [1], [0, 0, 1, 1], [], []>} : vector<16x44xf32>, vector<44x16xf32>, vector<16x16xf32> -> vector<16x16xf32>
    %109 = arith.addf %104, %108 : vector<16x16xf32>
    %c5_147 = arith.constant 5 : index
    %c0_148 = arith.constant 0 : index
    %110 = vector.load %arg6[%c5_147, %c0_148] : memref<22x44xf32, #tpu.memory_space<vmem>>, vector<16x44xf32>
    %c5_149 = arith.constant 5 : index
    %c0_150 = arith.constant 0 : index
    %c0_151 = arith.constant 0 : index
    %111 = vector.load %arg2[%c5_149, %c0_150, %c0_151] : memref<7x44x16xf32, #tpu.memory_space<vmem>>, vector<1x44x16xf32>
    %112 = vector.shape_cast %111 : vector<1x44x16xf32> to vector<44x16xf32>
    %cst_152 = arith.constant dense<0.000000e+00> : vector<16x16xf32>
    %113 = tpu.matmul %110, %112, %cst_152 {dimension_numbers = #tpu.dot_dimension_numbers<[1], [0], [0], [1], [0, 0, 1, 1], [], []>} : vector<16x44xf32>, vector<44x16xf32>, vector<16x16xf32> -> vector<16x16xf32>
    %114 = arith.addf %109, %113 : vector<16x16xf32>
    %c6_153 = arith.constant 6 : index
    %c0_154 = arith.constant 0 : index
    %115 = vector.load %arg6[%c6_153, %c0_154] : memref<22x44xf32, #tpu.memory_space<vmem>>, vector<16x44xf32>
    %c6_155 = arith.constant 6 : index
    %c0_156 = arith.constant 0 : index
    %c0_157 = arith.constant 0 : index
    %116 = vector.load %arg2[%c6_155, %c0_156, %c0_157] : memref<7x44x16xf32, #tpu.memory_space<vmem>>, vector<1x44x16xf32>
    %117 = vector.shape_cast %116 : vector<1x44x16xf32> to vector<44x16xf32>
    %cst_158 = arith.constant dense<0.000000e+00> : vector<16x16xf32>
    %118 = tpu.matmul %115, %117, %cst_158 {dimension_numbers = #tpu.dot_dimension_numbers<[1], [0], [0], [1], [0, 0, 1, 1], [], []>} : vector<16x44xf32>, vector<44x16xf32>, vector<16x16xf32> -> vector<16x16xf32>
    %119 = arith.addf %114, %118 : vector<16x16xf32>
    %c0_159 = arith.constant 0 : index
    %c0_160 = arith.constant 0 : index
    %120 = vector.load %arg7[%c0_159, %c0_160] : memref<16x16xf32, #tpu.memory_space<vmem>>, vector<16x16xf32>
    tpu.vector_store %arg7[%c0_159, %c0_160], %119 {strides = array<i32>} : memref<16x16xf32, #tpu.memory_space<vmem>>, vector<16x16xf32>,
    %c0_161 = arith.constant 0 : index
    %c0_162 = arith.constant 0 : index
    %121 = vector.load %arg7[%c0_161, %c0_162] : memref<16x16xf32, #tpu.memory_space<vmem>>, vector<1x16xf32>
    %c2_163 = arith.constant 2 : index
    %c0_164 = arith.constant 0 : index
    %122 = vector.load %arg5[%c2_163, %c0_164] : memref<3x256xf32, #tpu.memory_space<vmem>>, vector<1x16xf32>
    tpu.vector_store %arg5[%c2_163, %c0_164], %121 {strides = array<i32>} : memref<3x256xf32, #tpu.memory_space<vmem>>, vector<1x16xf32>,
    %c1_165 = arith.constant 1 : index
    %c0_166 = arith.constant 0 : index
    %123 = vector.load %arg7[%c1_165, %c0_166] : memref<16x16xf32, #tpu.memory_space<vmem>>, vector<1x16xf32>
    %c2_167 = arith.constant 2 : index
    %c16_168 = arith.constant 16 : index
    %124 = vector.load %arg5[%c2_167, %c16_168] : memref<3x256xf32, #tpu.memory_space<vmem>>, vector<1x16xf32>
    tpu.vector_store %arg5[%c2_167, %c16_168], %123 {strides = array<i32>} : memref<3x256xf32, #tpu.memory_space<vmem>>, vector<1x16xf32>,
    %c2_169 = arith.constant 2 : index
    %c0_170 = arith.constant 0 : index
    %125 = vector.load %arg7[%c2_169, %c0_170] : memref<16x16xf32, #tpu.memory_space<vmem>>, vector<1x16xf32>
    %c2_171 = arith.constant 2 : index
    %c32_172 = arith.constant 32 : index
    %126 = vector.load %arg5[%c2_171, %c32_172] : memref<3x256xf32, #tpu.memory_space<vmem>>, vector<1x16xf32>
    tpu.vector_store %arg5[%c2_171, %c32_172], %125 {strides = array<i32>} : memref<3x256xf32, #tpu.memory_space<vmem>>, vector<1x16xf32>,
    %c3_173 = arith.constant 3 : index
    %c0_174 = arith.constant 0 : index
    %127 = vector.load %arg7[%c3_173, %c0_174] : memref<16x16xf32, #tpu.memory_space<vmem>>, vector<1x16xf32>
    %c2_175 = arith.constant 2 : index
    %c48_176 = arith.constant 48 : index
    %128 = vector.load %arg5[%c2_175, %c48_176] : memref<3x256xf32, #tpu.memory_space<vmem>>, vector<1x16xf32>
    tpu.vector_store %arg5[%c2_175, %c48_176], %127 {strides = array<i32>} : memref<3x256xf32, #tpu.memory_space<vmem>>, vector<1x16xf32>,
    %c4_177 = arith.constant 4 : index
    %c0_178 = arith.constant 0 : index
    %129 = vector.load %arg7[%c4_177, %c0_178] : memref<16x16xf32, #tpu.memory_space<vmem>>, vector<1x16xf32>
    %c2_179 = arith.constant 2 : index
    %c64_180 = arith.constant 64 : index
    %130 = vector.load %arg5[%c2_179, %c64_180] : memref<3x256xf32, #tpu.memory_space<vmem>>, vector<1x16xf32>
    tpu.vector_store %arg5[%c2_179, %c64_180], %129 {strides = array<i32>} : memref<3x256xf32, #tpu.memory_space<vmem>>, vector<1x16xf32>,
    %c5_181 = arith.constant 5 : index
    %c0_182 = arith.constant 0 : index
    %131 = vector.load %arg7[%c5_181, %c0_182] : memref<16x16xf32, #tpu.memory_space<vmem>>, vector<1x16xf32>
    %c2_183 = arith.constant 2 : index
    %c80_184 = arith.constant 80 : index
    %132 = vector.load %arg5[%c2_183, %c80_184] : memref<3x256xf32, #tpu.memory_space<vmem>>, vector<1x16xf32>
    tpu.vector_store %arg5[%c2_183, %c80_184], %131 {strides = array<i32>} : memref<3x256xf32, #tpu.memory_space<vmem>>, vector<1x16xf32>,
    %c6_185 = arith.constant 6 : index
    %c0_186 = arith.constant 0 : index
    %133 = vector.load %arg7[%c6_185, %c0_186] : memref<16x16xf32, #tpu.memory_space<vmem>>, vector<1x16xf32>
    %c2_187 = arith.constant 2 : index
    %c96_188 = arith.constant 96 : index
    %134 = vector.load %arg5[%c2_187, %c96_188] : memref<3x256xf32, #tpu.memory_space<vmem>>, vector<1x16xf32>
    tpu.vector_store %arg5[%c2_187, %c96_188], %133 {strides = array<i32>} : memref<3x256xf32, #tpu.memory_space<vmem>>, vector<1x16xf32>,
    %c7_189 = arith.constant 7 : index
    %c0_190 = arith.constant 0 : index
    %135 = vector.load %arg7[%c7_189, %c0_190] : memref<16x16xf32, #tpu.memory_space<vmem>>, vector<1x16xf32>
    %c2_191 = arith.constant 2 : index
    %c112_192 = arith.constant 112 : index
    %136 = vector.load %arg5[%c2_191, %c112_192] : memref<3x256xf32, #tpu.memory_space<vmem>>, vector<1x16xf32>
    tpu.vector_store %arg5[%c2_191, %c112_192], %135 {strides = array<i32>} : memref<3x256xf32, #tpu.memory_space<vmem>>, vector<1x16xf32>,
    %c8_193 = arith.constant 8 : index
    %c0_194 = arith.constant 0 : index
    %137 = vector.load %arg7[%c8_193, %c0_194] : memref<16x16xf32, #tpu.memory_space<vmem>>, vector<1x16xf32>
    %c2_195 = arith.constant 2 : index
    %c128_196 = arith.constant 128 : index
    %138 = vector.load %arg5[%c2_195, %c128_196] : memref<3x256xf32, #tpu.memory_space<vmem>>, vector<1x16xf32>
    tpu.vector_store %arg5[%c2_195, %c128_196], %137 {strides = array<i32>} : memref<3x256xf32, #tpu.memory_space<vmem>>, vector<1x16xf32>,
    %c9_197 = arith.constant 9 : index
    %c0_198 = arith.constant 0 : index
    %139 = vector.load %arg7[%c9_197, %c0_198] : memref<16x16xf32, #tpu.memory_space<vmem>>, vector<1x16xf32>
    %c2_199 = arith.constant 2 : index
    %c144_200 = arith.constant 144 : index
    %140 = vector.load %arg5[%c2_199, %c144_200] : memref<3x256xf32, #tpu.memory_space<vmem>>, vector<1x16xf32>
    tpu.vector_store %arg5[%c2_199, %c144_200], %139 {strides = array<i32>} : memref<3x256xf32, #tpu.memory_space<vmem>>, vector<1x16xf32>,
    %c10_201 = arith.constant 10 : index
    %c0_202 = arith.constant 0 : index
    %141 = vector.load %arg7[%c10_201, %c0_202] : memref<16x16xf32, #tpu.memory_space<vmem>>, vector<1x16xf32>
    %c2_203 = arith.constant 2 : index
    %c160_204 = arith.constant 160 : index
    %142 = vector.load %arg5[%c2_203, %c160_204] : memref<3x256xf32, #tpu.memory_space<vmem>>, vector<1x16xf32>
    tpu.vector_store %arg5[%c2_203, %c160_204], %141 {strides = array<i32>} : memref<3x256xf32, #tpu.memory_space<vmem>>, vector<1x16xf32>,
    %c11_205 = arith.constant 11 : index
    %c0_206 = arith.constant 0 : index
    %143 = vector.load %arg7[%c11_205, %c0_206] : memref<16x16xf32, #tpu.memory_space<vmem>>, vector<1x16xf32>
    %c2_207 = arith.constant 2 : index
    %c176_208 = arith.constant 176 : index
    %144 = vector.load %arg5[%c2_207, %c176_208] : memref<3x256xf32, #tpu.memory_space<vmem>>, vector<1x16xf32>
    tpu.vector_store %arg5[%c2_207, %c176_208], %143 {strides = array<i32>} : memref<3x256xf32, #tpu.memory_space<vmem>>, vector<1x16xf32>,
    %c12_209 = arith.constant 12 : index
    %c0_210 = arith.constant 0 : index
    %145 = vector.load %arg7[%c12_209, %c0_210] : memref<16x16xf32, #tpu.memory_space<vmem>>, vector<1x16xf32>
    %c2_211 = arith.constant 2 : index
    %c192_212 = arith.constant 192 : index
    %146 = vector.load %arg5[%c2_211, %c192_212] : memref<3x256xf32, #tpu.memory_space<vmem>>, vector<1x16xf32>
    tpu.vector_store %arg5[%c2_211, %c192_212], %145 {strides = array<i32>} : memref<3x256xf32, #tpu.memory_space<vmem>>, vector<1x16xf32>,
    %c13_213 = arith.constant 13 : index
    %c0_214 = arith.constant 0 : index
    %147 = vector.load %arg7[%c13_213, %c0_214] : memref<16x16xf32, #tpu.memory_space<vmem>>, vector<1x16xf32>
    %c2_215 = arith.constant 2 : index
    %c208_216 = arith.constant 208 : index
    %148 = vector.load %arg5[%c2_215, %c208_216] : memref<3x256xf32, #tpu.memory_space<vmem>>, vector<1x16xf32>
    tpu.vector_store %arg5[%c2_215, %c208_216], %147 {strides = array<i32>} : memref<3x256xf32, #tpu.memory_space<vmem>>, vector<1x16xf32>,
    %c14_217 = arith.constant 14 : index
    %c0_218 = arith.constant 0 : index
    %149 = vector.load %arg7[%c14_217, %c0_218] : memref<16x16xf32, #tpu.memory_space<vmem>>, vector<1x16xf32>
    %c2_219 = arith.constant 2 : index
    %c224_220 = arith.constant 224 : index
    %150 = vector.load %arg5[%c2_219, %c224_220] : memref<3x256xf32, #tpu.memory_space<vmem>>, vector<1x16xf32>
    tpu.vector_store %arg5[%c2_219, %c224_220], %149 {strides = array<i32>} : memref<3x256xf32, #tpu.memory_space<vmem>>, vector<1x16xf32>,
    %c15_221 = arith.constant 15 : index
    %c0_222 = arith.constant 0 : index
    %151 = vector.load %arg7[%c15_221, %c0_222] : memref<16x16xf32, #tpu.memory_space<vmem>>, vector<1x16xf32>
    %c2_223 = arith.constant 2 : index
    %c240_224 = arith.constant 240 : index
    %152 = vector.load %arg5[%c2_223, %c240_224] : memref<3x256xf32, #tpu.memory_space<vmem>>, vector<1x16xf32>
    tpu.vector_store %arg5[%c2_223, %c240_224], %151 {strides = array<i32>} : memref<3x256xf32, #tpu.memory_space<vmem>>, vector<1x16xf32>,
    %c2_225 = arith.constant 2 : index
    %c0_226 = arith.constant 0 : index
    %153 = vector.load %arg5[%c2_225, %c0_226] : memref<3x256xf32, #tpu.memory_space<vmem>>, vector<1x256xf32>
    %c0_227 = arith.constant 0 : index
    %154 = memref.load %arg3[%c0_227] : memref<1xf32, #tpu.memory_space<smem>>
    %155 = vector.broadcast %154 : f32 to vector<1x256xf32>
    %156 = arith.addf %153, %155 : vector<1x256xf32>
    %157 = arith.negf %156 : vector<1x256xf32>
    %158 = math.exp %157 : vector<1x256xf32>
    %cst_228 = arith.constant 1.000000e+00 : f32
    %159 = vector.broadcast %cst_228 : f32 to vector<1x256xf32>
    %160 = arith.addf %159, %158 : vector<1x256xf32>
    %161 = arith.divf %159, %160 : vector<1x256xf32>
    %c0_229 = arith.constant 0 : index
    %c0_230 = arith.constant 0 : index
    %c0_231 = arith.constant 0 : index
    %162 = vector.load %arg1[%c0_229, %c0_230, %c0_231] : memref<1x4x256xf32, #tpu.memory_space<vmem>>, vector<1x4x256xf32>
    %163 = vector.shape_cast %162 : vector<1x4x256xf32> to vector<4x256xf32>
    %164 = vector.broadcast %161 : vector<1x256xf32> to vector<4x256xf32>
    %165 = arith.mulf %163, %164 : vector<4x256xf32>
    %c0_232 = arith.constant 0 : index
    %c0_233 = arith.constant 0 : index
    %c0_234 = arith.constant 0 : index
    %166 = vector.load %arg4[%c0_232, %c0_233, %c0_234] : memref<1x4x256xf32, #tpu.memory_space<vmem>>, vector<1x4x256xf32>
    %167 = vector.shape_cast %166 : vector<1x4x256xf32> to vector<4x256xf32>
    %168 = vector.shape_cast %165 : vector<4x256xf32> to vector<1x4x256xf32>
    tpu.vector_store %arg4[%c0_232, %c0_233, %c0_234], %168 {strides = array<i32>} : memref<1x4x256xf32, #tpu.memory_space<vmem>>, vector<1x4x256xf32>,
    return
  }
  func.func @transform_0(%arg0: i32) -> (i32, i32, i32) {
    %c0_i32 = arith.constant 0 : i32
    %c0_i32_0 = arith.constant 0 : i32
    %c0_i32_1 = arith.constant 0 : i32
    return %arg0, %c0_i32, %c0_i32_0 : i32, i32, i32
  }
  func.func @transform_1(%arg0: i32) -> (i32, i32, i32) {
    %c0_i32 = arith.constant 0 : i32
    %c0_i32_0 = arith.constant 0 : i32
    %c0_i32_1 = arith.constant 0 : i32
    %c0_i32_2 = arith.constant 0 : i32
    return %c0_i32, %c0_i32_0, %c0_i32_1 : i32, i32, i32
  }
  func.func @transform_2(%arg0: i32) -> i32 {
    %c0_i32 = arith.constant 0 : i32
    %c0_i32_0 = arith.constant 0 : i32
    return %c0_i32 : i32
  }
  func.func @transform_3(%arg0: i32) -> (i32, i32, i32) {
    %c0_i32 = arith.constant 0 : i32
    %c0_i32_0 = arith.constant 0 : i32
    %c0_i32_1 = arith.constant 0 : i32
    return %arg0, %c0_i32, %c0_i32_0 : i32, i32, i32
  }
}

</mosaic_0001>

<bundles_post_ra>
// kernel: tpu_custom_call.1
= control target key start
LH: loop header
LB: loop body
LE: loop exit
PB: predicated region body
PF: predicated region fallthrough
CT: control target
= control target key end

     0   :  { %s2221_s0 = inlined_call_operand.vmem [shape: f32[2,4,256], index: 0, kind: input, shape index: {}]   ;;  %s2222_s1 = inlined_call_operand.vmem [shape: f32[7,44,16], index: 1, kind: input, shape index: {}]   ;;  %s2223_s2 = inlined_call_operand.<no memory space> [shape: f32[1], index: 2, kind: input, shape index: {}]   ;;  %s2224_s3 = inlined_call_operand.hbm [shape: f32[2,4,256], index: 3, kind: output, shape index: {}]  }
   0x1   :  { %8 = sst [smem:[#allocation5]] %s2223_s2 }
   0x2   :  { %9 = vsyncpa [#allocation7], 0 }
   0x3   :  { %11 = vsyncpa [#allocation7 + $0x1], 0  ;;  %s1886_s14 = smov 0   ;;  %s1888_s15 = smov 0  }
   0x4   :  { %s1890_s16 = smov 0   ;;  %s1892_s17 = smov 0  }
   0x5 LB: > { %s1907_s2 = sadd.s32 4294967295, %s1835_s17   ;;  %s1441_s18 = sadd.s32 4294967294, %s1835_s17   ;;  %s1835_s17 = sphi %s1892_s17, %s2230_s17   ;;  %s1831_s16 = sphi %s1890_s16, %s2229_s16   ;;  %s1827_s15 = sphi %s1888_s15, %s2228_s15   ;;  %s1823_s14 = sphi %s1886_s14, %s2227_s14  }
   0x6   : > { %s1911_s19 = sadd.s32 1, %s1835_s17   ;;  %s92_s20 = sadd.s32 1, %s1831_s16 }
   0x7   : > { %s89_s21 = ssub.s32 %s1835_s17, %s1911_s19  ;;  %p102_p0 = scmp.ne.s32.totalorder %s1831_s16, %s1827_s15 }
   0x8   : > { %p90_p1 = scmp.eq.s32.totalorder %s89_s21, 0  ;;  %p103_p2 = scmp.eq.s32.totalorder %s1907_s2, 1 }
   0x9   : > { %p108_p3 = scmp.ne.s32.totalorder %s1827_s15, %s1823_s14  ;;  %p109_p4 = scmp.eq.s32.totalorder %s1441_s18, 1 }
   0xa   : > { %s1922_s22 = scalar_select %p90_p1, %s1831_s16, %s92_s20  }
   0xb   : > { %p1924_p5 = por %p103_p2, %p102_p0  ;;  %p1928_p6 = por %p109_p4, %p108_p3 }
   0xc   : > { %p1444_p7 = scmp.ge.s32.totalorder %s1835_s17, 1  ;;  %p141_p8 = scmp.lt.s32.totalorder %s1835_s17, 3 }
   0xe   : > { %p142_p9 = pnand %p1444_p7, %p141_p8 }
   0xf   : > { %p165_p10 = scmp.lt.s32.totalorder (!%p142_p9), %s1907_s2, 1  ;;  %s1839_s30 = smov (!%p142_p9), 99  }
  0x10   : > { %145 = sbr.rel (%p142_p9) target bundleno = 675 (0x2a3), region = 32  ;;  %s1840_s4 = smov (!%p142_p9), 3  }
  0x11   : > { %s1841_s5 = smov (!%p142_p9), 83   ;;  %s1842_s6 = smov (!%p142_p9), 115  }
  0x12   : > { %s1843_s7 = smov (!%p142_p9), 51   ;;  %s1844_s8 = smov (!%p142_p9), 67  }
  0x13   : > { %s1845_s9 = smov (!%p142_p9), 19   ;;  %s1846_s10 = smov (!%p142_p9), 35  }
  0x14   : > { %s1847_s11 = smov (!%p142_p9), 9   ;;  %s1848_s12 = smov (!%p142_p9), 25  }
  0x15   : > { %vm251_vm0 = vcmask 23552   ;;  %vm254_vm1 = vcmask 203928   ;;  %vm257_vm2 = vcmask 359752   ;;  %s166_s25 = scalar_select %p165_p10, %s1907_s2, 1  ;;  %v1837_v0 = vmov 0.0   ;;  %v1484_v50 = vld [vmem:[%s2222_s1 + $0x50] sm:$0xff] }
  0x16   : > { %252 = vst.msk [vmem:[#allocation3 + $0x3] sm:$0xff] %vm251_vm0, %v1837_v0  ;;  %253 = vst.msk [vmem:[#allocation3 + $0xb] sm:$0xff] %vm251_vm0, %v1837_v0  ;;  %vm174_vm3 = vcmask 1043456   ;;  %v1838_v13 = vmov 1966171168   ;;  %v195_v15 = vlaneseq  ;;  %vm248_vm5 = vcmask 354304  }
  0x17   : > { %255 = vst.msk [vmem:[#allocation3 + $0x3] sm:$0xff] %vm254_vm1, %v1837_v0  ;;  %256 = vst.msk [vmem:[#allocation3 + $0xb] sm:$0xff] %vm254_vm1, %v1837_v0  ;;  %s1543_s26 = sshll.u32 %s166_s25, 3  ;;  %v193_v14 = vunpack.c.l.s4 %v1838_v13  ;;  %v1485_v48 = vld [vmem:[%s2222_s1 + $0x58] sm:$0xf]  ;;  %s1849_s25 = smov 105  }
  0x18   : > { %258 = vst.msk [vmem:[#allocation3 + $0x3] sm:$0xff] %vm257_vm2, %v1837_v0  ;;  %259 = vst.msk [vmem:[#allocation3 + $0xb] sm:$0xff] %vm257_vm2, %v1837_v0  ;;  %s169_s29 = scalar_lea.vmem %s2221_s0, %s1543_s26  ;;  %v1955_v25 = vshrl.u32 %v195_v15, 7  ;;  %vm209_vm4 = vcmp.lt.s32.totalorder %v195_v15, 256  ;;  %v589_v49 = vld [vmem:[%s2222_s1 + $0x28] sm:$0xf]  ;;  %1601 = vmatprep.subr.msk.mxu0 %vm174_vm3, %v1485_v48 }
  0x19   : > { %v1945_v1 = vld [vmem:[%s169_s29] sm:$0xff]  ;;  %v194_v24 = vunpack.c.0.s8 %v193_v14  ;;  %249 = vst.msk [vmem:[#allocation3] sm:$0x7] %vm248_vm5, %v1837_v0  ;;  %250 = vst.msk [vmem:[#allocation3 + $0x13] sm:$0x7] %vm248_vm5, %v1837_v0  ;;  %s1850_s26 = smov 121   ;;  %1616 = vmatprep.subr.msk.mxu1 %vm174_vm3, %v589_v49  ;;  %1602 = vmatpush3.msk.msra.mxu0 %vm174_vm3, %v1485_v48 }
  0x1a   : > { %v172_v2 = vcombine.high %v1945_v1, %v1945_v1  ;;  %v175_v3 = vsel %vm174_vm3, %v1945_v1, -inf  ;;  %v212_v4 = vsel %vm174_vm3, %v1945_v1, 0.0  ;;  %1617 = vmatpush3.msk.msra.mxu1 %vm174_vm3, %v589_v49  ;;  %v588_v51 = vld [vmem:[%s2222_s1 + $0x20] sm:$0xff]  ;;  %v1483_v52 = vld [vmem:[%s2222_s1 + $0x48] sm:$0xff]  ;;  %v587_v53 = vld [vmem:[%s2222_s1 + $0x18] sm:$0xff]  ;;  %1603 = vmatprep.subr.mxu0 %v1484_v50  ;;  %s1853_s28 = smov 41  }
  0x1b   : > { %v176_v5 = vrot.slane %v175_v3, 4  ;;  %v213_v6 = vrot.slane %v212_v4, 4  ;;  %v197_v35 = vsub.s32 %v194_v24, %v1955_v25  ;;  %1618 = vmatprep.subr.mxu1 %v588_v51  ;;  %1604 = vmatpush3.msra.mxu0 %v1484_v50  ;;  %v1482_v54 = vld [vmem:[%s2222_s1 + $0x40] sm:$0xff]  ;;  %v586_v55 = vld [vmem:[%s2222_s1 + $0x10] sm:$0xff]  ;;  %s1854_s29 = smov 57   ;;  %v1481_v57 = vld [vmem:[%s2222_s1 + $0x38] sm:$0xff] }
  0x1c   : > { %v182_v7 = vsel %vm174_vm3, %v172_v2, -inf  ;;  %v219_v8 = vsel %vm174_vm3, %v172_v2, 0.0  ;;  %1619 = vmatpush3.msra.mxu1 %v588_v51  ;;  %1605 = vmatprep.subr.mxu0 %v1483_v52  ;;  %v585_v58 = vld [vmem:[%s2222_s1 + $0x8] sm:$0xff]  ;;  %v1480_v59 = vld [vmem:[%s2222_s1 + $0x30] sm:$0xff]  ;;  %v584_v60 = vld [vmem:[%s2222_s1] sm:$0xff]  ;;  %vm269_vm6 = vcmask 147480  }
  0x1d   : > { %v177_v9 = vmax.f32 %v175_v3, %v176_v5  ;;  %v183_v10 = vrot.slane %v182_v7, 4  ;;  %v214_v11 = vadd.f32 %v213_v6, %v212_v4  ;;  %v220_v12 = vrot.slane %v219_v8, 4  ;;  %1620 = vmatprep.subr.mxu1 %v587_v53  ;;  %1606 = vmatpush3.msra.mxu0 %v1483_v52  ;;  %v2023_v61 = vld [vmem:[%s2222_s1 + $0x88] sm:$0xf]  ;;  %v2028_v62 = vld [vmem:[%s2222_s1 + $0xb8] sm:$0xf] }
  0x1e   : > { %1621 = vmatpush3.msra.mxu1 %v587_v53  ;;  %1607 = vmatprep.subr.mxu0 %v1482_v54  ;;  %vm280_vm7 = vcmask 327880   ;;  %vm599_vm8 = vcmask 359424   ;;  %v1501_v48 = vld [vmem:[%s2222_s1 + $0x90] sm:$0xff]  ;;  %v1515_v49 = vld [vmem:[%s2222_s1 + $0xe8] sm:$0xf]  ;;  %vm1243_vm9 = vcmask 130048  }
  0x1f   : > { %v178_v16 = vrot.slane %v177_v9, 2  ;;  %v184_v17 = vmax.f32 %v182_v7, %v183_v10  ;;  %v215_v18 = vrot.slane %v214_v11, 2  ;;  %v221_v19 = vadd.f32 %v220_v12, %v219_v8  ;;  %1622 = vmatprep.subr.mxu1 %v586_v55  ;;  %1608 = vmatpush3.msra.mxu0 %v1482_v54  ;;  %v1524_v50 = vld [vmem:[%s2222_s1 + $0x118] sm:$0xf]  ;;  %v1514_v54 = vld [vmem:[%s2222_s1 + $0xe0] sm:$0xff] }
  0x20   : > { %1623 = vmatpush3.msra.mxu1 %v586_v55  ;;  %1609 = vmatprep.subr.mxu0 %v1481_v57  ;;  %v1523_v55 = vld [vmem:[%s2222_s1 + $0x110] sm:$0xff]  ;;  %vm1247_vm10 = vcmask 122880   ;;  %vm1254_vm11 = vcmask 254080   ;;  %vm1261_vm12 = vcmask 385280   ;;  %vm1268_vm13 = vcmask 516480  }
  0x21   : > { %v179_v20 = vmax.f32 %v177_v9, %v178_v16  ;;  %v185_v21 = vrot.slane %v184_v17, 2  ;;  %v216_v22 = vadd.f32 %v215_v18, %v214_v11  ;;  %v222_v23 = vrot.slane %v221_v19, 2  ;;  %1624 = vmatprep.subr.mxu1 %v585_v58  ;;  %1610 = vmatpush3.msra.mxu0 %v1481_v57  ;;  %v1513_v57 = vld [vmem:[%s2222_s1 + $0xd8] sm:$0xff] }
  0x22   : > { %1625 = vmatpush3.msra.mxu1 %v585_v58  ;;  %1611 = vmatprep.subr.mxu0 %v1480_v59  ;;  %v1522_v58 = vld [vmem:[%s2222_s1 + $0x108] sm:$0xff]  ;;  %vm1275_vm14 = vcmask 647680   ;;  %vm1282_vm15 = vcmask 778880   ;;  %vm1289_vm0 = vcmask 910080   ;;  %vm1296_vm1 = vcmask 1041280  }
  0x23   : > { %v180_v26 = vrot.slane %v179_v20, 1  ;;  %v186_v27 = vmax.f32 %v184_v17, %v185_v21  ;;  %v217_v28 = vrot.slane %v216_v22, 1  ;;  %v223_v29 = vadd.f32 %v222_v23, %v221_v19  ;;  %1626 = vmatprep.subr.mxu1 %v584_v60  ;;  %1612 = vmatpush3.msra.mxu0 %v1480_v59  ;;  %v1512_v59 = vld [vmem:[%s2222_s1 + $0xd0] sm:$0xff] }
  0x24   : > { %1627 = vmatpush3.msra.mxu1 %v584_v60  ;;  %1631 = vmatprep.subr.msk.mxu0 %vm174_vm3, %v2023_v61  ;;  %v1521_v60 = vld [vmem:[%s2222_s1 + $0x100] sm:$0xff] }
  0x25   : > { %v181_v30 = vmax.f32 %v179_v20, %v180_v26  ;;  %v187_v31 = vrot.slane %v186_v27, 1  ;;  %v218_v32 = vadd.f32 %v217_v28, %v216_v22  ;;  %v224_v33 = vrot.slane %v223_v29, 1  ;;  %1646 = vmatprep.subr.msk.mxu1 %vm174_vm3, %v2028_v62 }
  0x27   : > { %v188_v34 = vmax.f32 %v186_v27, %v187_v31  ;;  %v225_v36 = vadd.f32 %v224_v33, %v223_v29  ;;  %v226_v37 = vmul.f32 0.25, %v218_v32 }
  0x29   : > { %v191_v38 = vcombine.low %v181_v30, %v188_v34  ;;  %v227_v39 = vmul.f32 0.25, %v225_v36 }
  0x2b   : > { %v198_v40 = vrot.slane %v191_v38, %v197_v35  ;;  %v230_v41 = vcombine.low %v226_v37, %v227_v39  ;;  %v1496_v37 = vld [vmem:[%s2222_s1 + $0x80] sm:$0xff]  ;;  %v1505_v38 = vld [vmem:[%s2222_s1 + $0xb0] sm:$0xff] }
  0x2d   : > { %v205_v42 = vrot.slane %v198_v40, %v197_v35  ;;  %v237_v43 = vrot.slane %v230_v41, %v197_v35  ;;  %v1495_v41 = vld [vmem:[%s2222_s1 + $0x78] sm:$0xff] }
  0x2f   : > { %211 = vst.msk [vmem:[#allocation2] ss:$4 sm:$0x3] %vm209_vm4, %v205_v42  ;;  %v244_v44 = vrot.slane %v237_v43, %v197_v35  ;;  %v1504_v42 = vld [vmem:[%s2222_s1 + $0xa8] sm:$0xff]  ;;  %v1494_v43 = vld [vmem:[%s2222_s1 + $0x70] sm:$0xff] }
  0x31   : > { %247 = vst.msk [vmem:[#allocation2 + $0x1] ss:$4 sm:$0x3] %vm209_vm4, %v244_v44  ;;  %v1503_v44 = vld [vmem:[%s2222_s1 + $0xa0] sm:$0xff] }
  0x36   : > { %v1452_v45 = vld [vmem:[#allocation2] ss:$0 sm:$0xff]  ;;  %v1960_v46 = vld [vmem:[#allocation2 + $0x4] ss:$0 sm:$0xff] }
  0x37   : > { %308 = vrot.lane.b32.xlu1 %v1452_v45, %s1839_s30  ;;  %266 = vrot.lane.b32.xlu0 %v1452_v45, %s1840_s4 }
  0x38   : > { %v1451_v47 = vld [vmem:[#allocation2 + $0x1] ss:$0 sm:$0xff]  ;;  %v1467_v56 = vld [vmem:[#allocation2 + $0x5] ss:$0 sm:$0xff] }
  0x3b   : > { %328 = vrot.lane.b32.xlu1 %v1452_v45, %s1841_s5  ;;  %288 = vrot.lane.b32.xlu0 %v1452_v45, %s1842_s6 }
  0x3f   : > { %368 = vrot.lane.b32.xlu1 %v1452_v45, %s1843_s7  ;;  %348 = vrot.lane.b32.xlu0 %v1452_v45, %s1844_s8 }
  0x43   : > { %408 = vrot.lane.b32.xlu1 %v1452_v45, %s1845_s9  ;;  %388 = vrot.lane.b32.xlu0 %v1452_v45, %s1846_s10  ;;  %v1493_v45 = vld [vmem:[%s2222_s1 + $0x68] sm:$0xff] }
  0x47   : > { %448 = vrot.lane.b32.xlu1 %v1960_v46, %s1842_s6  ;;  %428 = vrot.lane.b32.xlu0 %v1960_v46, %s1840_s4  ;;  %s1851_s4 = smov 73  }
  0x4b   : > { %488 = vrot.lane.b32.xlu1 %v1960_v46, %s1841_s5  ;;  %468 = vrot.lane.b32.xlu0 %v1960_v46, %s1839_s30  ;;  %s1852_s5 = smov 89  }
  0x4f   : > { %528 = vrot.lane.b32.xlu1 %v1960_v46, %s1843_s7  ;;  %508 = vrot.lane.b32.xlu0 %v1960_v46, %s1844_s8  ;;  %s1544_s7 = sshll.u32 %s1907_s2, 7 }
  0x50   : > { %s1380_s21 = scalar_lea.hbm %s2224_s3, %s1544_s7 }
  0x53   : > { %298 = vrot.lane.b32.xlu1 %v1451_v47, %s1847_s11  ;;  %277 = vrot.lane.b32.xlu0 %v1451_v47, %s1848_s12 }
  0x57   : > { %338 = vrot.lane.b32.xlu1 %v1451_v47, %s1849_s25  ;;  %318 = vrot.lane.b32.xlu0 %v1451_v47, %s1850_s26 }
  0x5b   : > { %378 = vrot.lane.b32.xlu1 %v1451_v47, %s1851_s4  ;;  %358 = vrot.lane.b32.xlu0 %v1451_v47, %s1852_s5 }
  0x5f   : > { %418 = vrot.lane.b32.xlu1 %v1451_v47, %s1853_s28  ;;  %398 = vrot.lane.b32.xlu0 %v1451_v47, %s1854_s29  ;;  %v1492_v47 = vld [vmem:[%s2222_s1 + $0x60] sm:$0xff] }
  0x63   : > { %458 = vrot.lane.b32.xlu1 %v1467_v56, %s1847_s11  ;;  %438 = vrot.lane.b32.xlu0 %v1467_v56, %s1848_s12  ;;  %s1855_s12 = smov 16   ;;  %s1862_s11 = smov [#allocation6]  }
  0x67   : > { %498 = vrot.lane.b32.xlu1 %v1467_v56, %s1849_s25  ;;  %478 = vrot.lane.b32.xlu0 %v1467_v56, %s1850_s26  ;;  %s1858_s25 = smov 64   ;;  %s1859_s26 = smov 80  }
  0x6b   : > { %538 = vrot.lane.b32.xlu1 %v1467_v56, %s1851_s4  ;;  %518 = vrot.lane.b32.xlu0 %v1467_v56, %s1852_s5  ;;  %s1860_s4 = smov 96   ;;  %s1861_s5 = smov 112  }
  0x6f   : > { %548 = vrot.lane.b32.xlu0 %v1960_v46, %s1846_s10  ;;  %558 = vrot.lane.b32.xlu1 %v1467_v56, %s1854_s29  ;;  %s1857_s10 = smov 48   ;;  %s162_s29 = sand.u32 1, %s1827_s15  }
  0x70   : > { %s1445_s6 = sshll.u32 %s162_s29, 3  ;;  %s1368_s27 = scalar_lea.sflag [#allocation7], %s162_s29 }
  0x71   : > { %s164_s8 = scalar_lea.vmem [#allocation6], %s1445_s6 }
  0x72   : > { %s1382_s13 = sshll.u32 %s164_s8, 4  ;;  %s1383_s13 = int_to_ptr.vmem [resolvable:$true] %s1382_s13 }
  0x73   : > { %568 = vrot.lane.b32.xlu0 %v1960_v46, %s1845_s9  ;;  %578 = vrot.lane.b32.xlu1 %v1467_v56, %s1853_s28  ;;  %v1502_v46 = vld [vmem:[%s2222_s1 + $0x98] sm:$0xff]  ;;  %s1856_s9 = smov 32   ;;  %s1344_s28 = sld [smem:[#allocation5]] }
  0x74   : > { %s1775_s30 = scalar_lea.vmem %s1383_s13, 128 }
  0x75   : > { %p1776_p11 = scmp.ne.s32.totalorder %s1383_s13, %s1775_s30 }
  0x77   : > { %p1777_p12 = pnand %p1776_p11, %p1924_p5 }
  0x79   : > { %p1778_p13 = pneg %p1777_p12 }
  0xa9   : > { %v309_v63 = vpop.permute.xlu1 %308  ;;  %v267_v0 = vpop.permute.xlu0 %266 }
  0xaa   : > { %311 = vst.msk [vmem:[#allocation3 + $0x5] sm:$0x1] %vm269_vm6, %v309_v63  ;;  %270 = vst.msk [vmem:[#allocation3 + $0x3] sm:$0x1] %vm269_vm6, %v267_v0  ;;  %v1510_v63 = vld [vmem:[%s2222_s1 + $0xc0] sm:$0xff]  ;;  %v1519_v0 = vld [vmem:[%s2222_s1 + $0xf0] sm:$0xff] }
  0xad   : > { %v329_v2 = vpop.permute.xlu1 %328  ;;  %v289_v3 = vpop.permute.xlu0 %288 }
  0xae   : > { %331 = vst.msk [vmem:[#allocation3 + $0x6] sm:$0x1] %vm269_vm6, %v329_v2  ;;  %291 = vst.msk [vmem:[#allocation3 + $0x4] sm:$0x1] %vm269_vm6, %v289_v3  ;;  %v1533_v2 = vld [vmem:[%s2222_s1 + $0x148] sm:$0xf] }
  0xb1   : > { %v369_v4 = vpop.permute.xlu1 %368  ;;  %v349_v5 = vpop.permute.xlu0 %348 }
  0xb2   : > { %371 = vst.msk [vmem:[#allocation3 + $0x8] sm:$0x1] %vm269_vm6, %v369_v4  ;;  %351 = vst.msk [vmem:[#allocation3 + $0x7] sm:$0x1] %vm269_vm6, %v349_v5 }
  0xb5   : > { %v409_v6 = vpop.permute.xlu1 %408  ;;  %v389_v7 = vpop.permute.xlu0 %388 }
  0xb6   : > { %411 = vst.msk [vmem:[#allocation3 + $0xa] sm:$0x1] %vm269_vm6, %v409_v6  ;;  %391 = vst.msk [vmem:[#allocation3 + $0x9] sm:$0x1] %vm269_vm6, %v389_v7  ;;  %v1532_v6 = vld [vmem:[%s2222_s1 + $0x140] sm:$0xff]  ;;  %v1531_v7 = vld [vmem:[%s2222_s1 + $0x138] sm:$0xff] }
  0xb9   : > { %v449_v8 = vpop.permute.xlu1 %448  ;;  %v429_v9 = vpop.permute.xlu0 %428 }
  0xba   : > { %451 = vst.msk [vmem:[#allocation3 + $0xc] sm:$0x1] %vm269_vm6, %v449_v8  ;;  %431 = vst.msk [vmem:[#allocation3 + $0xb] sm:$0x1] %vm269_vm6, %v429_v9  ;;  %v1530_v8 = vld [vmem:[%s2222_s1 + $0x130] sm:$0xff]  ;;  %v1529_v9 = vld [vmem:[%s2222_s1 + $0x128] sm:$0xff] }
  0xbd   : > { %v489_v10 = vpop.permute.xlu1 %488  ;;  %v469_v11 = vpop.permute.xlu0 %468 }
  0xbe   : > { %491 = vst.msk [vmem:[#allocation3 + $0xe] sm:$0x1] %vm269_vm6, %v489_v10  ;;  %471 = vst.msk [vmem:[#allocation3 + $0xd] sm:$0x1] %vm269_vm6, %v469_v11  ;;  %v1528_v10 = vld [vmem:[%s2222_s1 + $0x120] sm:$0xff] }
  0xc1   : > { %v529_v12 = vpop.permute.xlu1 %528  ;;  %v509_v13 = vpop.permute.xlu0 %508 }
  0xc2   : > { %531 = vst.msk [vmem:[#allocation3 + $0x10] sm:$0x1] %vm269_vm6, %v529_v12  ;;  %511 = vst.msk [vmem:[#allocation3 + $0xf] sm:$0x1] %vm269_vm6, %v509_v13 }
  0xc5   : > { %v299_v14 = vpop.permute.xlu1 %298  ;;  %v278_v15 = vpop.permute.xlu0 %277 }
  0xc6   : > { %301 = vst.msk [vmem:[#allocation3 + $0x4] sm:$0x1] %vm280_vm7, %v299_v14  ;;  %281 = vst.msk [vmem:[#allocation3 + $0x3] sm:$0x1] %vm280_vm7, %v278_v15 }
  0xc9   : > { %v339_v16 = vpop.permute.xlu1 %338  ;;  %v319_v17 = vpop.permute.xlu0 %318 }
  0xca   : > { %341 = vst.msk [vmem:[#allocation3 + $0x6] sm:$0x1] %vm280_vm7, %v339_v16  ;;  %321 = vst.msk [vmem:[#allocation3 + $0x5] sm:$0x1] %vm280_vm7, %v319_v17 }
  0xcd   : > { %v379_v18 = vpop.permute.xlu1 %378  ;;  %v359_v19 = vpop.permute.xlu0 %358 }
  0xce   : > { %381 = vst.msk [vmem:[#allocation3 + $0x8] sm:$0x1] %vm280_vm7, %v379_v18  ;;  %361 = vst.msk [vmem:[#allocation3 + $0x7] sm:$0x1] %vm280_vm7, %v359_v19 }
  0xd1   : > { %v419_v20 = vpop.permute.xlu1 %418  ;;  %v399_v21 = vpop.permute.xlu0 %398 }
  0xd2   : > { %421 = vst.msk [vmem:[#allocation3 + $0xa] sm:$0x1] %vm280_vm7, %v419_v20  ;;  %401 = vst.msk [vmem:[#allocation3 + $0x9] sm:$0x1] %vm280_vm7, %v399_v21 }
  0xd5   : > { %v459_v22 = vpop.permute.xlu1 %458  ;;  %v439_v23 = vpop.permute.xlu0 %438  ;;  %v590_v24 = vld [vmem:[#allocation3 + $0x1] sm:$0xff] }
  0xd6   : > { %v582_v26 = vld [vmem:[#allocation3] sm:$0xff]  ;;  %461 = vst.msk [vmem:[#allocation3 + $0xc] sm:$0x1] %vm280_vm7, %v459_v22  ;;  %441 = vst.msk [vmem:[#allocation3 + $0xb] sm:$0x1] %vm280_vm7, %v439_v23  ;;  %1613 = vmatprep.mubr.msk.f32.mxu0 %vm599_vm8, %v590_v24 }
  0xd7   : > { %1628 = vmatprep.mubr.msk.f32.mxu1 %vm599_vm8, %v582_v26 }
  0xd9   : > { %v499_v27 = vpop.permute.xlu1 %498  ;;  %v479_v28 = vpop.permute.xlu0 %478  ;;  %v768_v39 = vld [vmem:[#allocation3 + $0x2] sm:$0xff] }
  0xda   : > { %501 = vst.msk [vmem:[#allocation3 + $0xe] sm:$0x1] %vm280_vm7, %v499_v27  ;;  %481 = vst.msk [vmem:[#allocation3 + $0xd] sm:$0x1] %vm280_vm7, %v479_v28  ;;  %v863_v40 = vld [vmem:[#allocation3 + $0x3] sm:$0xff] }
  0xdd   : > { %v539_v29 = vpop.permute.xlu1 %538  ;;  %v519_v30 = vpop.permute.xlu0 %518  ;;  %v958_v53 = vld [vmem:[#allocation3 + $0x4] sm:$0xff] }
  0xde   : > { %541 = vst.msk [vmem:[#allocation3 + $0x10] sm:$0x1] %vm280_vm7, %v539_v29  ;;  %521 = vst.msk [vmem:[#allocation3 + $0xf] sm:$0x1] %vm280_vm7, %v519_v30  ;;  %v1053_v56 = vld [vmem:[#allocation3 + $0x5] sm:$0xff] }
  0xe1   : > { %v549_v31 = vpop.permute.xlu0 %548  ;;  %v559_v32 = vpop.permute.xlu1 %558  ;;  %v1148_v5 = vld [vmem:[#allocation3 + $0x6] sm:$0xff] }
  0xe2   : > { %551 = vst.msk [vmem:[#allocation3 + $0x11] sm:$0x1] %vm269_vm6, %v549_v31 }
  0xe3   : > { %561 = vst.msk [vmem:[#allocation3 + $0x11] sm:$0x1] %vm280_vm7, %v559_v32 }
  0xe5   : > { %v569_v33 = vpop.permute.xlu0 %568  ;;  %v579_v34 = vpop.permute.xlu1 %578  ;;  %v591_v35 = vld [vmem:[#allocation3 + $0x9] sm:$0xff] }
  0xe6   : > { %v583_v36 = vld [vmem:[#allocation3 + $0x8] sm:$0xff]  ;;  %571 = vst.msk [vmem:[#allocation3 + $0x12] sm:$0x1] %vm269_vm6, %v569_v33  ;;  %1614 = vmatmul.mubr.msk.f32.vlgmr.msra.gmra.mxu0 %vm599_vm8, %v591_v35 }
  0xe7   : > { %1629 = vmatmul.mubr.msk.f32.vlgmr.msra.gmra.mxu1 %vm599_vm8, %v583_v36  ;;  %581 = vst.msk [vmem:[#allocation3 + $0x12] sm:$0x1] %vm280_vm7, %v579_v34  ;;  %1632 = vmatpush3.msk.msra.mxu0 %vm174_vm3, %v2023_v61  ;;  %v1511_v61 = vld [vmem:[%s2222_s1 + $0xc8] sm:$0xff] }
  0xe8   : > { %1647 = vmatpush3.msk.msra.mxu1 %vm174_vm3, %v2028_v62  ;;  %1633 = vmatprep.subr.mxu0 %v1496_v37  ;;  %v1520_v62 = vld [vmem:[%s2222_s1 + $0xf8] sm:$0xff] }
  0xe9   : > { %1643 = vmatprep.mubr.msk.f32.mxu0 %vm599_vm8, %v768_v39  ;;  %1648 = vmatprep.subr.mxu1 %v1505_v38 }
  0xea   : > { %1658 = vmatprep.mubr.msk.f32.mxu1 %vm599_vm8, %v863_v40  ;;  %1634 = vmatpush3.msra.mxu0 %v1496_v37  ;;  %v769_v51 = vld [vmem:[#allocation3 + $0xa] sm:$0xff] }
  0xeb   : > { %1649 = vmatpush3.msra.mxu1 %v1505_v38  ;;  %1635 = vmatprep.subr.mxu0 %v1495_v41 }
  0xec   : > { %1650 = vmatprep.subr.mxu1 %v1504_v42  ;;  %1636 = vmatpush3.msra.mxu0 %v1495_v41 }
  0xed   : > { %1651 = vmatpush3.msra.mxu1 %v1504_v42  ;;  %1637 = vmatprep.subr.mxu0 %v1494_v43 }
  0xee   : > { %1652 = vmatprep.subr.mxu1 %v1503_v44  ;;  %1638 = vmatpush3.msra.mxu0 %v1494_v43  ;;  %v864_v52 = vld [vmem:[#allocation3 + $0xb] sm:$0xff] }
  0xef   : > { %1653 = vmatpush3.msra.mxu1 %v1503_v44  ;;  %1639 = vmatprep.subr.mxu0 %v1493_v45  ;;  %v959_v3 = vld [vmem:[#allocation3 + $0xc] sm:$0xff] }
  0xf0   : > { %1654 = vmatprep.subr.mxu1 %v1502_v46  ;;  %1640 = vmatpush3.msra.mxu0 %v1493_v45  ;;  %v1054_v4 = vld [vmem:[#allocation3 + $0xd] sm:$0xff] }
  0xf1   : > { %1655 = vmatpush3.msra.mxu1 %v1502_v46  ;;  %1641 = vmatprep.subr.mxu0 %v1492_v47  ;;  %v1149_v11 = vld [vmem:[#allocation3 + $0xe] sm:$0xff] }
  0xf2   : > { %1656 = vmatprep.subr.mxu1 %v1501_v48  ;;  %1642 = vmatpush3.msra.mxu0 %v1492_v47 }
  0xf3   : > { %1657 = vmatpush3.msra.mxu1 %v1501_v48  ;;  %1644 = vmatmul.mubr.msk.f32.vlgmr.msra.gmra.mxu0 %vm599_vm8, %v769_v51 }
  0xf4   : > { %1659 = vmatmul.mubr.msk.f32.vlgmr.msra.gmra.mxu1 %vm599_vm8, %v864_v52  ;;  %1661 = vmatprep.subr.msk.mxu0 %vm174_vm3, %v1515_v49 }
  0xf5   : > { %1676 = vmatprep.subr.msk.mxu1 %vm174_vm3, %v1524_v50  ;;  %1662 = vmatpush3.msk.msra.mxu0 %vm174_vm3, %v1515_v49 }
  0xf6   : > { %1673 = vmatprep.mubr.msk.f32.mxu0 %vm599_vm8, %v958_v53  ;;  %1677 = vmatpush3.msk.msra.mxu1 %vm174_vm3, %v1524_v50 }
  0xf7   : > { %1688 = vmatprep.mubr.msk.f32.mxu1 %vm599_vm8, %v1053_v56  ;;  %1663 = vmatprep.subr.mxu0 %v1514_v54 }
  0xf8   : > { %1678 = vmatprep.subr.mxu1 %v1523_v55  ;;  %1664 = vmatpush3.msra.mxu0 %v1514_v54 }
  0xf9   : > { %1679 = vmatpush3.msra.mxu1 %v1523_v55  ;;  %1665 = vmatprep.subr.mxu0 %v1513_v57 }
  0xfa   : > { %1680 = vmatprep.subr.mxu1 %v1522_v58  ;;  %1666 = vmatpush3.msra.mxu0 %v1513_v57 }
  0xfb   : > { %1681 = vmatpush3.msra.mxu1 %v1522_v58  ;;  %1667 = vmatprep.subr.mxu0 %v1512_v59 }
  0xfc   : > { %1682 = vmatprep.subr.mxu1 %v1521_v60  ;;  %1668 = vmatpush3.msra.mxu0 %v1512_v59 }
  0xfd   : > { %1683 = vmatpush3.msra.mxu1 %v1521_v60  ;;  %1669 = vmatprep.subr.mxu0 %v1511_v61 }
  0xfe   : > { %1684 = vmatprep.subr.mxu1 %v1520_v62  ;;  %1670 = vmatpush3.msra.mxu0 %v1511_v61 }
  0xff   : > { %1685 = vmatpush3.msra.mxu1 %v1520_v62  ;;  %1671 = vmatprep.subr.mxu0 %v1510_v63 }
 0x100   : > { %1686 = vmatprep.subr.mxu1 %v1519_v0  ;;  %1672 = vmatpush3.msra.mxu0 %v1510_v63 }
 0x101   : > { %1687 = vmatpush3.msra.mxu1 %v1519_v0  ;;  %1674 = vmatmul.mubr.msk.f32.vlgmr.msra.gmra.mxu0 %vm599_vm8, %v959_v3 }
 0x102   : > { %1689 = vmatmul.mubr.msk.f32.vlgmr.msra.gmra.mxu1 %vm599_vm8, %v1054_v4  ;;  %1691 = vmatprep.subr.msk.mxu0 %vm174_vm3, %v1533_v2 }
 0x103   : > { %1703 = vmatprep.mubr.msk.f32.mxu0 %vm599_vm8, %v1148_v5  ;;  %1692 = vmatpush3.msk.msra.mxu0 %vm174_vm3, %v1533_v2 }
 0x104   : > { %1693 = vmatprep.subr.mxu0 %v1532_v6 }
 0x105   : > { %1694 = vmatpush3.msra.mxu0 %v1532_v6  ;;  %v1345_v6 = vstv %s1344_s28 }
 0x106   : > { %1695 = vmatprep.subr.mxu0 %v1531_v7 }
 0x107   : > { %1696 = vmatpush3.msra.mxu0 %v1531_v7 }
 0x108   : > { %1697 = vmatprep.subr.mxu0 %v1530_v8 }
 0x109   : > { %1698 = vmatpush3.msra.mxu0 %v1530_v8 }
 0x10a   : > { %1699 = vmatprep.subr.mxu0 %v1529_v9 }
 0x10b   : > { %1700 = vmatpush3.msra.mxu0 %v1529_v9 }
 0x10c   : > { %1701 = vmatprep.subr.mxu0 %v1528_v10 }
 0x10d   : > { %1702 = vmatpush3.msra.mxu0 %v1528_v10 }
 0x10e   : > { %1704 = vmatmul.mubr.msk.f32.vlgmr.msra.gmra.mxu0 %vm599_vm8, %v1149_v11 }
 0x1a6   : > { %v1615_v12 = vpop.f32.mrf.mxu0 }
 0x1a7   : > { %v1630_v13 = vpop.f32.mrf.mxu1 }
 0x1a8   : > { %v675_v14 = vpop.f32.mrf.mxu0  ;;  %v765_v17 = vadd.f32 %v1630_v13, %v1615_v12  ;;  %v1357_v12 = vsub.s32 0, %v1955_v25  ;;  %v1361_v13 = vsub.s32 1, %v1955_v25 }
 0x1a9   : > { %v759_v16 = vpop.f32.mrf.mxu1 }
 0x1aa   : > { %v760_v19 = vadd.f32 %v759_v16, %v675_v14 }
 0x1b3   : > { %v1645_v15 = vpop.f32.mrf.mxu0 }
 0x1b4   : > { %v862_v20 = vadd.f32 %v1645_v15, %v765_v17  ;;  %v1660_v21 = vpop.f32.mrf.mxu1 }
 0x1b5   : > { %v852_v18 = vpop.f32.mrf.mxu0 }
 0x1b6   : > { %v861_v23 = vadd.f32 %v852_v18, %v760_v19  ;;  %v957_v24 = vadd.f32 %v1660_v21, %v862_v20  ;;  %v947_v26 = vpop.f32.mrf.mxu1 }
 0x1b8   : > { %v956_v28 = vadd.f32 %v947_v26, %v861_v23 }
 0x1c1   : > { %v1675_v22 = vpop.f32.mrf.mxu0 }
 0x1c2   : > { %v1052_v29 = vadd.f32 %v1675_v22, %v957_v24  ;;  %v1690_v30 = vpop.f32.mrf.mxu1 }
 0x1c3   : > { %v1042_v27 = vpop.f32.mrf.mxu0 }
 0x1c4   : > { %v1051_v31 = vadd.f32 %v1042_v27, %v956_v28  ;;  %v1147_v32 = vadd.f32 %v1690_v30, %v1052_v29  ;;  %v1137_v33 = vpop.f32.mrf.mxu1 }
 0x1c6   : > { %v1146_v35 = vadd.f32 %v1137_v33, %v1051_v31 }
 0x1ce   : > { %v1705_v34 = vpop.f32.mrf.mxu0 }
 0x1cf   : > { %v1242_v36 = vadd.f32 %v1705_v34, %v1147_v32 }
 0x1d0   : > { %v1232_v37 = vpop.f32.mrf.mxu0 }
 0x1d1   : > { %1245 = vst.msk [vmem:[#allocation4 + $0x8] sm:$0xff] %vm1243_vm9, %v1242_v36  ;;  %v1241_v38 = vadd.f32 %v1232_v37, %v1146_v35 }
 0x1d3   : > { %1244 = vst.msk [vmem:[#allocation4] sm:$0xff] %vm1243_vm9, %v1241_v38 }
 0x1d8   : > { %v1300_v39 = vld [vmem:[#allocation4 + $0x9] sm:$0x1]  ;;  %v1306_v41 = vld [vmem:[#allocation4 + $0xa] sm:$0x1]  ;;  %v1298_v42 = vld [vmem:[#allocation4 + $0x8] sm:$0x1] }
 0x1d9   : > { %1302 = vrot.lane.b32.xlu1 %v1300_v39, %s1855_s12  ;;  %1299 = vst.msk [vmem:[#allocation2 + $0x6] sm:$0x1] %vm1247_vm10, %v1298_v42  ;;  %v1312_v45 = vld [vmem:[#allocation4 + $0xb] sm:$0x1]  ;;  %v1318_v47 = vld [vmem:[#allocation4 + $0xc] sm:$0x1] }
 0x1da   : > { %v1249_v40 = vld [vmem:[#allocation4 + $0x1] sm:$0x1]  ;;  %v1246_v43 = vld [vmem:[#allocation4] sm:$0x1]  ;;  %v1256_v44 = vld [vmem:[#allocation4 + $0x2] sm:$0x1] }
 0x1db   : > { %1251 = vrot.lane.b32.xlu0 %v1249_v40, %s1855_s12  ;;  %1248 = vst.msk [vmem:[#allocation2 + $0x2] sm:$0x1] %vm1247_vm10, %v1246_v43  ;;  %v1263_v46 = vld [vmem:[#allocation4 + $0x3] sm:$0x1]  ;;  %v1270_v48 = vld [vmem:[#allocation4 + $0x4] sm:$0x1] }
 0x1dc   : > { %v1324_v49 = vld [vmem:[#allocation4 + $0xd] sm:$0x1]  ;;  %v1277_v50 = vld [vmem:[#allocation4 + $0x5] sm:$0x1]  ;;  %v1330_v51 = vld [vmem:[#allocation4 + $0xe] sm:$0x1] }
 0x1dd   : > { %1308 = vrot.lane.b32.xlu1 %v1306_v41, %s1856_s9  ;;  %v1284_v52 = vld [vmem:[#allocation4 + $0x6] sm:$0x1]  ;;  %v1336_v53 = vld [vmem:[#allocation4 + $0xf] sm:$0x1]  ;;  %v1291_v54 = vld [vmem:[#allocation4 + $0x7] sm:$0x1] }
 0x1de   : > { %s1779_s12 = sshll.u32 %s1862_s11, 4  ;;  %s1780_s12 = int_to_ptr.vmem [resolvable:$false] %s1779_s12 }
 0x1df   : > { %1258 = vrot.lane.b32.xlu0 %v1256_v44, %s1856_s9  ;;  %s1781_s2 = scalar_lea.vmem %s1780_s12, 256  ;;  %p1782_p0 = scmp.lt.s32.totalorder %s1383_s13, %s1780_s12 }
 0x1e0   : > { %p1783_p1 = scmp.lt.s32.totalorder %s1781_s2, %s1775_s30 }
 0x1e1   : > { %1314 = vrot.lane.b32.xlu1 %v1312_v45, %s1857_s10 }
 0x1e2   : > { %p1784_p2 = por %p1783_p1, %p1782_p0 }
 0x1e3   : > { %1265 = vrot.lane.b32.xlu0 %v1263_v46, %s1857_s10 }
 0x1e4   : > { %p1785_p3 = pnand %p1784_p2, %p1778_p13 }
 0x1e5   : > { %1320 = vrot.lane.b32.xlu1 %v1318_v47, %s1858_s25 }
 0x1e7   : > { %1272 = vrot.lane.b32.xlu0 %v1270_v48, %s1858_s25 }
 0x1e9   : > { %1326 = vrot.lane.b32.xlu1 %v1324_v49, %s1859_s26 }
 0x1eb   : > { %1279 = vrot.lane.b32.xlu0 %v1277_v50, %s1859_s26 }
 0x1ed   : > { %1332 = vrot.lane.b32.xlu1 %v1330_v51, %s1860_s4 }
 0x1ef   : > { %1286 = vrot.lane.b32.xlu0 %v1284_v52, %s1860_s4 }
 0x1f1   : > { %1338 = vrot.lane.b32.xlu1 %v1336_v53, %s1861_s5 }
 0x1f3   : > { %1293 = vrot.lane.b32.xlu0 %v1291_v54, %s1861_s5 }
 0x24b   : > { %v1303_v55 = vpop.permute.xlu1 %1302 }
 0x24c   : > { %1305 = vst.msk [vmem:[#allocation2 + $0x6] sm:$0x1] %vm1254_vm11, %v1303_v55 }
 0x24d   : > { %v1252_v56 = vpop.permute.xlu0 %1251 }
 0x24e   : > { %1255 = vst.msk [vmem:[#allocation2 + $0x2] sm:$0x1] %vm1254_vm11, %v1252_v56 }
 0x24f   : > { %v1309_v57 = vpop.permute.xlu1 %1308 }
 0x250   : > { %1311 = vst.msk [vmem:[#allocation2 + $0x6] sm:$0x1] %vm1261_vm12, %v1309_v57 }
 0x251   : > { %v1259_v58 = vpop.permute.xlu0 %1258 }
 0x252   : > { %1262 = vst.msk [vmem:[#allocation2 + $0x2] sm:$0x1] %vm1261_vm12, %v1259_v58 }
 0x253   : > { %v1315_v59 = vpop.permute.xlu1 %1314 }
 0x254   : > { %1317 = vst.msk [vmem:[#allocation2 + $0x6] sm:$0x1] %vm1268_vm13, %v1315_v59 }
 0x255   : > { %v1266_v60 = vpop.permute.xlu0 %1265 }
 0x256   : > { %1269 = vst.msk [vmem:[#allocation2 + $0x2] sm:$0x1] %vm1268_vm13, %v1266_v60 }
 0x257   : > { %v1321_v61 = vpop.permute.xlu1 %1320 }
 0x258   : > { %1323 = vst.msk [vmem:[#allocation2 + $0x6] sm:$0x1] %vm1275_vm14, %v1321_v61 }
 0x259   : > { %v1273_v62 = vpop.permute.xlu0 %1272 }
 0x25a   : > { %1276 = vst.msk [vmem:[#allocation2 + $0x2] sm:$0x1] %vm1275_vm14, %v1273_v62 }
 0x25b   : > { %v1327_v63 = vpop.permute.xlu1 %1326 }
 0x25c   : > { %1329 = vst.msk [vmem:[#allocation2 + $0x6] sm:$0x1] %vm1282_vm15, %v1327_v63 }
 0x25d   : > { %v1280_v0 = vpop.permute.xlu0 %1279 }
 0x25e   : > { %1283 = vst.msk [vmem:[#allocation2 + $0x2] sm:$0x1] %vm1282_vm15, %v1280_v0 }
 0x25f   : > { %v1333_v2 = vpop.permute.xlu1 %1332 }
 0x260   : > { %1335 = vst.msk [vmem:[#allocation2 + $0x6] sm:$0x1] %vm1289_vm0, %v1333_v2 }
 0x261   : > { %v1287_v3 = vpop.permute.xlu0 %1286 }
 0x262   : > { %1290 = vst.msk [vmem:[#allocation2 + $0x2] sm:$0x1] %vm1289_vm0, %v1287_v3 }
 0x263   : > { %v1339_v4 = vpop.permute.xlu1 %1338 }
 0x264   : > { %1341 = vst.msk [vmem:[#allocation2 + $0x6] sm:$0x1] %vm1296_vm1, %v1339_v4 }
 0x265   : > { %v1294_v5 = vpop.permute.xlu0 %1293 }
 0x266   : > { %1297 = vst.msk [vmem:[#allocation2 + $0x2] sm:$0x1] %vm1296_vm1, %v1294_v5 }
 0x26d   : > { %v1343_v7 = vld [vmem:[#allocation2 + $0x2] ss:$4 sm:$0x3] }
 0x26e   : > { %v1346_v8 = vadd.f32 %v1345_v6, %v1343_v7 }
 0x270   : > { %v1537_v9 = vmul.f32 -1.442695, %v1346_v8 }
 0x272   : > { %1771 = vpow2.f32 %v1537_v9 }
 0x27f   : > { %v1772_v10 = vpop.eup %1771 }
 0x280   : > { %v1350_v11 = vadd.f32 1.0, %v1772_v10 }
 0x282   : > { %1773 = vrcp.f32 %v1350_v11 }
 0x28f   : > { %v1774_v14 = vpop.eup %1773 }
 0x290   : > { %v1358_v15 = vrot.slane %v1774_v14, %v1357_v12  ;;  %v1362_v16 = vrot.slane %v1774_v14, %v1361_v13 }
 0x292   : > { %v1363_v17 = vcombine.low %v1358_v15, %v1362_v16 }
 0x294   : > { %v1365_v18 = vmul.f32 %v1363_v17, %v1945_v1 }
 0x296   : > { %1366 = vst [vmem:[%s164_s8] sm:$0xff] %v1365_v18 }
 0x297   : > { %1788 = shalt.err (!%p1785_p3)
}
 0x298   : > { %s1789_s9 = scalar_lea.hbm %s1380_s21, 128  ;;  %s1793_s26 = scalar_lea.hbm %s2224_s3, 256 }
 0x299   : > { %p1790_p4 = scmp.ne.s32.totalorder %s1380_s21, %s1789_s9  ;;  %p1794_p9 = scmp.lt.s32.totalorder %s1380_s21, %s2224_s3 }
 0x29a   : > { %p1795_p10 = scmp.lt.s32.totalorder %s1793_s26, %s1789_s9 }
 0x29b   : > { %p1791_p7 = pnand %p1790_p4, %p1924_p5 }
 0x29c   : > { %p1796_p11 = por %p1795_p10, %p1794_p9 }
 0x29d   : > { %p1792_p8 = pneg %p1791_p7 }
 0x29f   : > { %p1797_p12 = pnand %p1796_p11, %p1792_p8 }
 0x2a1   : > { %1800 = shalt.err (!%p1797_p12)
}
 0x2a2   : > { %1706 = dma.vmem_to_hbm [thread:$0]  (%p1924_p5), %s1383_s13, 128, %s1380_s21, %s1368_s27  }
 0x2a3 PF: > { %p1712_p13 = scmp.ge.s32.totalorder %s1835_s17, 2  ;;  %s1394_s28 = sand.u32 1, %s1823_s14  }
 0x2a4   : > { %s1395_s29 = scalar_lea.sflag [#allocation7], %s1394_s28 }
 0x2a5   : > { %p1709_p0 = pnand %p1712_p13, %p1928_p6 }
 0x2a7   : > { %p1710_p1 = pneg %p1709_p0 }
 0x2a9   : > { %1818 = dma.done.wait (%p1710_p1), %s1395_s29, 128  }
 0x2aa   : > { %1820 = vsyncadd (%p1710_p1), %s1395_s29, 4294967168  ;;  %p14_p2 = scmp.ge.s32.totalorder %s1911_s19, 4   ;;  %s2227_s14 = smov %s1827_s15 }
 0x2ab   : > { %s2228_s15 = smov %s1831_s16  ;;  %s2229_s16 = smov %s1922_s22 }
 0x2ac   : > { %s2230_s17 = smov %s1911_s19  ;;  %16 = sbr.rel (!%p14_p2) target bundleno = 5 (0x5), region = 75 }
 0x2b1   :  { %1400 = vsyncpa [#allocation7], 1 }
 0x2b2   :  { %1402 = vsyncpa [#allocation7 + $0x1], 1 }

</bundles_post_ra>
